<compile_context>
chip_gen: v5e
topology: v5e:2x2
jax: 0.10.0
libtpu: 0.0.40
codegen_flags: <defaults>
</compile_context>

<pallas_src>
import functools

import jax
import jax.numpy as jnp
import numpy as np
from jax.experimental import pallas as pl
from jax.experimental.pallas import tpu as pltpu

_GL = 128  # per-gate lane slot (one full vreg lane group per gate)


def _joint_embedder_kernel(x_ref, wi_ref, wh_ref, bi_ref, bhn_ref, out_ref, gi_ref,
                           *, T, Bp):
    # x_ref  : (T*Bp, J*F)    time-major rows, row = t*Bp + b (b >= B rows are zero pad)
    # wi_ref : (J*F, 3*GL)    conv-fused GRU input weights, gate g in lanes [g*GL, g*GL+H)
    # wh_ref : (GL, 3*GL)     fused hidden weights, rows >= H and pad lanes are zero
    # bi_ref : (1, 3*GL)      [bir+bhr | biz+bhz | bin], zero in pad lanes
    # bhn_ref: (1, GL)        hidden bias of the n-gate (stays inside r * (...))
    # out_ref: (B, H)         final hidden state h_T (unpadded)
    # gi_ref : (T*Bp, 3*GL)   VMEM scratch for the hoisted input-side gate projections
    B, H = out_ref.shape
    GL = _GL

    wh = wh_ref[...]
    bhn = bhn_ref[...]

    # Hoisted, batched input-side projection for ALL timesteps (conv 1x1 + all three
    # input gate matmuls + folded biases) in a single MXU op; staged to VMEM scratch.
    gi_ref[...] = jnp.dot(x_ref[...], wi_ref[...],
                          preferred_element_type=jnp.float32) + bi_ref[...]

    h = jnp.zeros((Bp, GL), jnp.float32)
    # T is small and static -> unrolled recurrence; only the h-dependent path is serial.
    for t in range(T):
        gi = gi_ref[pl.ds(t * Bp, Bp), :]                               # 8-sublane aligned
        gh = jnp.dot(h, wh, preferred_element_type=jnp.float32)         # (Bp, 3*GL)
        r = jax.nn.sigmoid(gi[:, 0:GL] + gh[:, 0:GL])                   # 128-aligned slices
        z = jax.nn.sigmoid(gi[:, GL:2 * GL] + gh[:, GL:2 * GL])
        n = jnp.tanh(gi[:, 2 * GL:3 * GL] + r * (gh[:, 2 * GL:3 * GL] + bhn))
        h = (1.0 - z) * n + z * h

    out_ref[...] = h[:B, :H].astype(out_ref.dtype)


def fuse_joint_embedder_params(params, J=3):
    """One-time parameter fusion / padding. Call at init, NOT per forward."""
    D, F_ = params["w_proj"].shape
    H = params["w_hh"].shape[1]
    GL = _GL
    assert H <= GL, "output_dim > 128 needs multi-slot gate packing"  # TODO(synk)
    assert params["w_ih"].shape[1] == J * D, "GRU input_size must equal J*inner_dim"

    wp_t = params["w_proj"].T.astype(jnp.float32)                    # (F, D)
    wp_big = jnp.kron(jnp.eye(J, dtype=jnp.float32), wp_t)           # (J*F, J*D), j-major rows

    w_ih = params["w_ih"].astype(jnp.float32)                        # (3H, J*D) [r;z;n]
    w_hh = params["w_hh"].astype(jnp.float32)                        # (3H, H)
    b_ih = params["b_ih"].astype(jnp.float32)
    b_hh = params["b_hh"].astype(jnp.float32)

    # Fuse conv into the GRU input weights: x @ Wp_big @ W_ih^T == x @ W_in_fused.
    wi = wp_big @ w_ih.T                                              # (J*F, 3H), rows (j, f)
    # Reorder rows to (f-major, j-minor) so x only needs transpose (2,0,1,3).
    wi = wi.reshape(J, F_, 3 * H).transpose(1, 0, 2).reshape(J * F_, 3 * H)
    wh = w_hh.T                                                       # (H, 3H)

    # Pad each gate into its own 128-lane slot; pad regions are zero (inert).
    wi_p = jnp.zeros((J * F_, 3 * GL), jnp.float32)
    wh_p = jnp.zeros((GL, 3 * GL), jnp.float32)
    bi_p = jnp.zeros((1, 3 * GL), jnp.float32)
    # r/z hidden biases fold into the input-side bias; the n hidden bias cannot.
    bi = b_ih + jnp.concatenate([b_hh[:2 * H], jnp.zeros((H,), jnp.float32)])
    for g in range(3):
        wi_p = wi_p.at[:, g * GL:g * GL + H].set(wi[:, g * H:(g + 1) * H])
        wh_p = wh_p.at[:H, g * GL:g * GL + H].set(wh[:, g * H:(g + 1) * H])
        bi_p = bi_p.at[:, g * GL:g * GL + H].set(bi[g * H:(g + 1) * H].reshape(1, H))
    bhn_p = jnp.zeros((1, GL), jnp.float32).at[:, :H].set(b_hh[2 * H:].reshape(1, H))

    return dict(wi=wi_p, wh=wh_p, bi=bi_p, bhn=bhn_p, H=H, F=F_, J=J)


def joint_embedder_forward(x, fused):
    """x: (B, F, T, J) float32. `fused` from fuse_joint_embedder_params. -> (B, H)."""
    B, F_, T, J = x.shape
    assert F_ == fused["F"] and J == fused["J"]
    H, GL = fused["H"], _GL
    Bp = max(8, ((B + 7) // 8) * 8)       # sublane-align the batch dimension

    # (B, F, T, J) -> (T, B, F, J) -> pad batch -> (T*Bp, F*J); feature index = f*J + j
    # (matches the f-major, j-minor row order baked into the fused weights).
    x2 = jnp.transpose(x, (2, 0, 1, 3)).reshape(T, B, F_ * J).astype(jnp.float32)
    x2 = jnp.pad(x2, ((0, 0), (0, Bp - B), (0, 0))).reshape(T * Bp, F_ * J)

    args = (x2, fused["wi"], fused["wh"], fused["bi"], fused["bhn"])

    flops = 2 * T * Bp * (F_ * J) * (3 * GL) + 2 * T * Bp * GL * (3 * GL)
    bytes_accessed = int(sum(int(np.prod(a.shape)) * 4 for a in args) + B * H * 4)
    cost = pl.CostEstimate(flops=int(flops),
                           transcendentals=int(3 * T * Bp * GL),
                           bytes_accessed=bytes_accessed)

    # Everything fits trivially in VMEM (< 400 KB total) -> whole-array blocks, no grid.
    vmem = pl.BlockSpec(memory_space=pltpu.MemorySpace.VMEM)
    return pl.pallas_call(
        functools.partial(_joint_embedder_kernel, T=T, Bp=Bp),
        out_shape=jax.ShapeDtypeStruct((B, H), jnp.float32),
        in_specs=[vmem] * len(args),
        out_specs=vmem,
        scratch_shapes=[pltpu.VMEM((T * Bp, 3 * GL), jnp.float32)],
        cost_estimate=cost,
    )(*args)


# ---------------------------- pure-JAX reference (for checking) ----------------------
def reference_forward(x, params):
    B, F_, T, J = x.shape
    D = params["w_proj"].shape[0]
    H = params["w_hh"].shape[1]
    xp = x.reshape(B, F_, T * J)
    y = jnp.einsum("cf,bfl->bcl", params["w_proj"], xp)        # Conv1d k=1, no bias
    y = y.reshape(B, D, T, J).transpose(0, 2, 3, 1).reshape(B, T, J * D)
    w_ih, w_hh = params["w_ih"], params["w_hh"]
    b_ih, b_hh = params["b_ih"], params["b_hh"]
    h = jnp.zeros((B, H), jnp.float32)
    for t in range(T):
        gi = y[:, t, :] @ w_ih.T + b_ih
        gh = h @ w_hh.T + b_hh
        i_r, i_z, i_n = jnp.split(gi, 3, axis=1)
        h_r, h_z, h_n = jnp.split(gh, 3, axis=1)
        r = jax.nn.sigmoid(i_r + h_r)
        z = jax.nn.sigmoid(i_z + h_z)
        n = jnp.tanh(i_n + r * h_n)
        h = (1.0 - z) * n + z * h
    return h


def init_params(key, inner_dim, output_dim, cond_dim=6):
    D, H = inner_dim, output_dim
    in_sz = 3 * D
    k1, k2, k3, k4, k5 = jax.random.split(key, 5)
    sc = 1.0 / np.sqrt(cond_dim)       # Conv1d default init bound
    sg = 1.0 / np.sqrt(H)              # GRU default init bound
    return dict(
        w_proj=jax.random.uniform(k1, (D, cond_dim), jnp.float32, -sc, sc),
        w_ih=jax.random.uniform(k2, (3 * H, in_sz), jnp.float32, -sg, sg),
        w_hh=jax.random.uniform(k3, (3 * H, H), jnp.float32, -sg, sg),
        b_ih=jax.random.uniform(k4, (3 * H,), jnp.float32, -sg, sg),
        b_hh=jax.random.uniform(k5, (3 * H,), jnp.float32, -sg, sg),
    )


if __name__ == "__main__":
    key = jax.random.PRNGKey(0)
    B, cond_dim, T, J = 2, 6, 8, 3          # J must be 3 (GRU input_size = 3*inner_dim)
    inner_dim, output_dim = 16, 32

    kx, kp = jax.random.split(key)
    x = jax.random.normal(kx, (B, cond_dim, T, J), jnp.float32)
    params = init_params(kp, inner_dim, output_dim, cond_dim)

    # One-time parameter fusion (hoisted out of the per-forward hot path).
    fused = fuse_joint_embedder_params(params, J=J)
    fused = jax.tree.map(jax.block_until_ready, fused)

    out = joint_embedder_forward(x, fused)
    out = jax.block_until_ready(out)

    ref = reference_forward(x, params)
    np.testing.assert_allclose(np.asarray(out), np.asarray(ref), rtol=1e-4, atol=1e-4)
    print("KERNEL_OK")
</pallas_src>

<mosaic_0001>
module attributes {stable_mosaic.version = 11 : i64} {
  func.func @_joint_embedder_kernel(%arg0: memref<64x18xf32, #tpu.memory_space<vmem>>, %arg1: memref<18x384xf32, #tpu.memory_space<vmem>>, %arg2: memref<128x384xf32, #tpu.memory_space<vmem>>, %arg3: memref<1x384xf32, #tpu.memory_space<vmem>>, %arg4: memref<1x128xf32, #tpu.memory_space<vmem>>, %arg5: memref<2x32xf32, #tpu.memory_space<vmem>>, %arg6: memref<64x384xf32, #tpu.memory_space<vmem>>) attributes {dimension_semantics = [], scalar_prefetch = 0 : i64, scratch_operands = 1 : i64, tpu.core_type = #tpu.core_type<tc>} {
    %c0 = arith.constant 0 : index
    %c0_0 = arith.constant 0 : index
    %0 = vector.load %arg2[%c0, %c0_0] : memref<128x384xf32, #tpu.memory_space<vmem>>, vector<128x384xf32>
    %c0_1 = arith.constant 0 : index
    %c0_2 = arith.constant 0 : index
    %1 = vector.load %arg4[%c0_1, %c0_2] : memref<1x128xf32, #tpu.memory_space<vmem>>, vector<1x128xf32>
    %c0_3 = arith.constant 0 : index
    %c0_4 = arith.constant 0 : index
    %2 = vector.load %arg0[%c0_3, %c0_4] : memref<64x18xf32, #tpu.memory_space<vmem>>, vector<64x18xf32>
    %c0_5 = arith.constant 0 : index
    %c0_6 = arith.constant 0 : index
    %3 = vector.load %arg1[%c0_5, %c0_6] : memref<18x384xf32, #tpu.memory_space<vmem>>, vector<18x384xf32>
    %cst = arith.constant dense<0.000000e+00> : vector<64x384xf32>
    %4 = tpu.matmul %2, %3, %cst {dimension_numbers = #tpu.dot_dimension_numbers<[1], [0], [0], [1], [0, 0, 1, 1], [], []>} : vector<64x18xf32>, vector<18x384xf32>, vector<64x384xf32> -> vector<64x384xf32>
    %c0_7 = arith.constant 0 : index
    %c0_8 = arith.constant 0 : index
    %5 = vector.load %arg3[%c0_7, %c0_8] : memref<1x384xf32, #tpu.memory_space<vmem>>, vector<1x384xf32>
    %6 = vector.broadcast %5 : vector<1x384xf32> to vector<64x384xf32>
    %7 = arith.addf %4, %6 : vector<64x384xf32>
    %c0_9 = arith.constant 0 : index
    %c0_10 = arith.constant 0 : index
    %8 = vector.load %arg6[%c0_9, %c0_10] : memref<64x384xf32, #tpu.memory_space<vmem>>, vector<64x384xf32>
    tpu.vector_store %arg6[%c0_9, %c0_10], %7 {strides = array<i32>} : memref<64x384xf32, #tpu.memory_space<vmem>>, vector<64x384xf32>,
    %cst_11 = arith.constant 0.000000e+00 : f32
    %9 = vector.broadcast %cst_11 : f32 to vector<8x128xf32>
    %c0_12 = arith.constant 0 : index
    %c0_13 = arith.constant 0 : index
    %10 = vector.load %arg6[%c0_12, %c0_13] : memref<64x384xf32, #tpu.memory_space<vmem>>, vector<8x384xf32>
    %cst_14 = arith.constant dense<0.000000e+00> : vector<8x384xf32>
    %11 = tpu.matmul %9, %0, %cst_14 {dimension_numbers = #tpu.dot_dimension_numbers<[1], [0], [0], [1], [0, 0, 1, 1], [], []>} : vector<8x128xf32>, vector<128x384xf32>, vector<8x384xf32> -> vector<8x384xf32>
    %12 = vector.extract_strided_slice %10 {offsets = [0, 0], sizes = [8, 128], strides = [1, 1]} : vector<8x384xf32> to vector<8x128xf32>
    %13 = vector.extract_strided_slice %11 {offsets = [0, 0], sizes = [8, 128], strides = [1, 1]} : vector<8x384xf32> to vector<8x128xf32>
    %14 = arith.addf %12, %13 : vector<8x128xf32>
    %15 = arith.negf %14 : vector<8x128xf32>
    %16 = math.exp %15 : vector<8x128xf32>
    %cst_15 = arith.constant 1.000000e+00 : f32
    %17 = vector.broadcast %cst_15 : f32 to vector<8x128xf32>
    %18 = arith.addf %17, %16 : vector<8x128xf32>
    %19 = arith.divf %17, %18 : vector<8x128xf32>
    %20 = vector.extract_strided_slice %10 {offsets = [0, 128], sizes = [8, 128], strides = [1, 1]} : vector<8x384xf32> to vector<8x128xf32>
    %21 = vector.extract_strided_slice %11 {offsets = [0, 128], sizes = [8, 128], strides = [1, 1]} : vector<8x384xf32> to vector<8x128xf32>
    %22 = arith.addf %20, %21 : vector<8x128xf32>
    %23 = arith.negf %22 : vector<8x128xf32>
    %24 = math.exp %23 : vector<8x128xf32>
    %cst_16 = arith.constant 1.000000e+00 : f32
    %25 = vector.broadcast %cst_16 : f32 to vector<8x128xf32>
    %26 = arith.addf %25, %24 : vector<8x128xf32>
    %27 = arith.divf %25, %26 : vector<8x128xf32>
    %28 = vector.extract_strided_slice %10 {offsets = [0, 256], sizes = [8, 128], strides = [1, 1]} : vector<8x384xf32> to vector<8x128xf32>
    %29 = vector.extract_strided_slice %11 {offsets = [0, 256], sizes = [8, 128], strides = [1, 1]} : vector<8x384xf32> to vector<8x128xf32>
    %30 = vector.broadcast %1 : vector<1x128xf32> to vector<8x128xf32>
    %31 = arith.addf %29, %30 : vector<8x128xf32>
    %32 = arith.mulf %19, %31 : vector<8x128xf32>
    %33 = arith.addf %28, %32 : vector<8x128xf32>
    %34 = math.tanh %33 : vector<8x128xf32>
    %cst_17 = arith.constant 1.000000e+00 : f32
    %35 = vector.broadcast %cst_17 : f32 to vector<8x128xf32>
    %36 = arith.subf %35, %27 : vector<8x128xf32>
    %37 = arith.mulf %36, %34 : vector<8x128xf32>
    %38 = arith.mulf %27, %9 : vector<8x128xf32>
    %39 = arith.addf %37, %38 : vector<8x128xf32>
    %c8 = arith.constant 8 : index
    %c0_18 = arith.constant 0 : index
    %40 = vector.load %arg6[%c8, %c0_18] : memref<64x384xf32, #tpu.memory_space<vmem>>, vector<8x384xf32>
    %cst_19 = arith.constant dense<0.000000e+00> : vector<8x384xf32>
    %41 = tpu.matmul %39, %0, %cst_19 {dimension_numbers = #tpu.dot_dimension_numbers<[1], [0], [0], [1], [0, 0, 1, 1], [], []>} : vector<8x128xf32>, vector<128x384xf32>, vector<8x384xf32> -> vector<8x384xf32>
    %42 = vector.extract_strided_slice %40 {offsets = [0, 0], sizes = [8, 128], strides = [1, 1]} : vector<8x384xf32> to vector<8x128xf32>
    %43 = vector.extract_strided_slice %41 {offsets = [0, 0], sizes = [8, 128], strides = [1, 1]} : vector<8x384xf32> to vector<8x128xf32>
    %44 = arith.addf %42, %43 : vector<8x128xf32>
    %45 = arith.negf %44 : vector<8x128xf32>
    %46 = math.exp %45 : vector<8x128xf32>
    %cst_20 = arith.constant 1.000000e+00 : f32
    %47 = vector.broadcast %cst_20 : f32 to vector<8x128xf32>
    %48 = arith.addf %47, %46 : vector<8x128xf32>
    %49 = arith.divf %47, %48 : vector<8x128xf32>
    %50 = vector.extract_strided_slice %40 {offsets = [0, 128], sizes = [8, 128], strides = [1, 1]} : vector<8x384xf32> to vector<8x128xf32>
    %51 = vector.extract_strided_slice %41 {offsets = [0, 128], sizes = [8, 128], strides = [1, 1]} : vector<8x384xf32> to vector<8x128xf32>
    %52 = arith.addf %50, %51 : vector<8x128xf32>
    %53 = arith.negf %52 : vector<8x128xf32>
    %54 = math.exp %53 : vector<8x128xf32>
    %cst_21 = arith.constant 1.000000e+00 : f32
    %55 = vector.broadcast %cst_21 : f32 to vector<8x128xf32>
    %56 = arith.addf %55, %54 : vector<8x128xf32>
    %57 = arith.divf %55, %56 : vector<8x128xf32>
    %58 = vector.extract_strided_slice %40 {offsets = [0, 256], sizes = [8, 128], strides = [1, 1]} : vector<8x384xf32> to vector<8x128xf32>
    %59 = vector.extract_strided_slice %41 {offsets = [0, 256], sizes = [8, 128], strides = [1, 1]} : vector<8x384xf32> to vector<8x128xf32>
    %60 = vector.broadcast %1 : vector<1x128xf32> to vector<8x128xf32>
    %61 = arith.addf %59, %60 : vector<8x128xf32>
    %62 = arith.mulf %49, %61 : vector<8x128xf32>
    %63 = arith.addf %58, %62 : vector<8x128xf32>
    %64 = math.tanh %63 : vector<8x128xf32>
    %cst_22 = arith.constant 1.000000e+00 : f32
    %65 = vector.broadcast %cst_22 : f32 to vector<8x128xf32>
    %66 = arith.subf %65, %57 : vector<8x128xf32>
    %67 = arith.mulf %66, %64 : vector<8x128xf32>
    %68 = arith.mulf %57, %39 : vector<8x128xf32>
    %69 = arith.addf %67, %68 : vector<8x128xf32>
    %c16 = arith.constant 16 : index
    %c0_23 = arith.constant 0 : index
    %70 = vector.load %arg6[%c16, %c0_23] : memref<64x384xf32, #tpu.memory_space<vmem>>, vector<8x384xf32>
    %cst_24 = arith.constant dense<0.000000e+00> : vector<8x384xf32>
    %71 = tpu.matmul %69, %0, %cst_24 {dimension_numbers = #tpu.dot_dimension_numbers<[1], [0], [0], [1], [0, 0, 1, 1], [], []>} : vector<8x128xf32>, vector<128x384xf32>, vector<8x384xf32> -> vector<8x384xf32>
    %72 = vector.extract_strided_slice %70 {offsets = [0, 0], sizes = [8, 128], strides = [1, 1]} : vector<8x384xf32> to vector<8x128xf32>
    %73 = vector.extract_strided_slice %71 {offsets = [0, 0], sizes = [8, 128], strides = [1, 1]} : vector<8x384xf32> to vector<8x128xf32>
    %74 = arith.addf %72, %73 : vector<8x128xf32>
    %75 = arith.negf %74 : vector<8x128xf32>
    %76 = math.exp %75 : vector<8x128xf32>
    %cst_25 = arith.constant 1.000000e+00 : f32
    %77 = vector.broadcast %cst_25 : f32 to vector<8x128xf32>
    %78 = arith.addf %77, %76 : vector<8x128xf32>
    %79 = arith.divf %77, %78 : vector<8x128xf32>
    %80 = vector.extract_strided_slice %70 {offsets = [0, 128], sizes = [8, 128], strides = [1, 1]} : vector<8x384xf32> to vector<8x128xf32>
    %81 = vector.extract_strided_slice %71 {offsets = [0, 128], sizes = [8, 128], strides = [1, 1]} : vector<8x384xf32> to vector<8x128xf32>
    %82 = arith.addf %80, %81 : vector<8x128xf32>
    %83 = arith.negf %82 : vector<8x128xf32>
    %84 = math.exp %83 : vector<8x128xf32>
    %cst_26 = arith.constant 1.000000e+00 : f32
    %85 = vector.broadcast %cst_26 : f32 to vector<8x128xf32>
    %86 = arith.addf %85, %84 : vector<8x128xf32>
    %87 = arith.divf %85, %86 : vector<8x128xf32>
    %88 = vector.extract_strided_slice %70 {offsets = [0, 256], sizes = [8, 128], strides = [1, 1]} : vector<8x384xf32> to vector<8x128xf32>
    %89 = vector.extract_strided_slice %71 {offsets = [0, 256], sizes = [8, 128], strides = [1, 1]} : vector<8x384xf32> to vector<8x128xf32>
    %90 = vector.broadcast %1 : vector<1x128xf32> to vector<8x128xf32>
    %91 = arith.addf %89, %90 : vector<8x128xf32>
    %92 = arith.mulf %79, %91 : vector<8x128xf32>
    %93 = arith.addf %88, %92 : vector<8x128xf32>
    %94 = math.tanh %93 : vector<8x128xf32>
    %cst_27 = arith.constant 1.000000e+00 : f32
    %95 = vector.broadcast %cst_27 : f32 to vector<8x128xf32>
    %96 = arith.subf %95, %87 : vector<8x128xf32>
    %97 = arith.mulf %96, %94 : vector<8x128xf32>
    %98 = arith.mulf %87, %69 : vector<8x128xf32>
    %99 = arith.addf %97, %98 : vector<8x128xf32>
    %c24 = arith.constant 24 : index
    %c0_28 = arith.constant 0 : index
    %100 = vector.load %arg6[%c24, %c0_28] : memref<64x384xf32, #tpu.memory_space<vmem>>, vector<8x384xf32>
    %cst_29 = arith.constant dense<0.000000e+00> : vector<8x384xf32>
    %101 = tpu.matmul %99, %0, %cst_29 {dimension_numbers = #tpu.dot_dimension_numbers<[1], [0], [0], [1], [0, 0, 1, 1], [], []>} : vector<8x128xf32>, vector<128x384xf32>, vector<8x384xf32> -> vector<8x384xf32>
    %102 = vector.extract_strided_slice %100 {offsets = [0, 0], sizes = [8, 128], strides = [1, 1]} : vector<8x384xf32> to vector<8x128xf32>
    %103 = vector.extract_strided_slice %101 {offsets = [0, 0], sizes = [8, 128], strides = [1, 1]} : vector<8x384xf32> to vector<8x128xf32>
    %104 = arith.addf %102, %103 : vector<8x128xf32>
    %105 = arith.negf %104 : vector<8x128xf32>
    %106 = math.exp %105 : vector<8x128xf32>
    %cst_30 = arith.constant 1.000000e+00 : f32
    %107 = vector.broadcast %cst_30 : f32 to vector<8x128xf32>
    %108 = arith.addf %107, %106 : vector<8x128xf32>
    %109 = arith.divf %107, %108 : vector<8x128xf32>
    %110 = vector.extract_strided_slice %100 {offsets = [0, 128], sizes = [8, 128], strides = [1, 1]} : vector<8x384xf32> to vector<8x128xf32>
    %111 = vector.extract_strided_slice %101 {offsets = [0, 128], sizes = [8, 128], strides = [1, 1]} : vector<8x384xf32> to vector<8x128xf32>
    %112 = arith.addf %110, %111 : vector<8x128xf32>
    %113 = arith.negf %112 : vector<8x128xf32>
    %114 = math.exp %113 : vector<8x128xf32>
    %cst_31 = arith.constant 1.000000e+00 : f32
    %115 = vector.broadcast %cst_31 : f32 to vector<8x128xf32>
    %116 = arith.addf %115, %114 : vector<8x128xf32>
    %117 = arith.divf %115, %116 : vector<8x128xf32>
    %118 = vector.extract_strided_slice %100 {offsets = [0, 256], sizes = [8, 128], strides = [1, 1]} : vector<8x384xf32> to vector<8x128xf32>
    %119 = vector.extract_strided_slice %101 {offsets = [0, 256], sizes = [8, 128], strides = [1, 1]} : vector<8x384xf32> to vector<8x128xf32>
    %120 = vector.broadcast %1 : vector<1x128xf32> to vector<8x128xf32>
    %121 = arith.addf %119, %120 : vector<8x128xf32>
    %122 = arith.mulf %109, %121 : vector<8x128xf32>
    %123 = arith.addf %118, %122 : vector<8x128xf32>
    %124 = math.tanh %123 : vector<8x128xf32>
    %cst_32 = arith.constant 1.000000e+00 : f32
    %125 = vector.broadcast %cst_32 : f32 to vector<8x128xf32>
    %126 = arith.subf %125, %117 : vector<8x128xf32>
    %127 = arith.mulf %126, %124 : vector<8x128xf32>
    %128 = arith.mulf %117, %99 : vector<8x128xf32>
    %129 = arith.addf %127, %128 : vector<8x128xf32>
    %c32 = arith.constant 32 : index
    %c0_33 = arith.constant 0 : index
    %130 = vector.load %arg6[%c32, %c0_33] : memref<64x384xf32, #tpu.memory_space<vmem>>, vector<8x384xf32>
    %cst_34 = arith.constant dense<0.000000e+00> : vector<8x384xf32>
    %131 = tpu.matmul %129, %0, %cst_34 {dimension_numbers = #tpu.dot_dimension_numbers<[1], [0], [0], [1], [0, 0, 1, 1], [], []>} : vector<8x128xf32>, vector<128x384xf32>, vector<8x384xf32> -> vector<8x384xf32>
    %132 = vector.extract_strided_slice %130 {offsets = [0, 0], sizes = [8, 128], strides = [1, 1]} : vector<8x384xf32> to vector<8x128xf32>
    %133 = vector.extract_strided_slice %131 {offsets = [0, 0], sizes = [8, 128], strides = [1, 1]} : vector<8x384xf32> to vector<8x128xf32>
    %134 = arith.addf %132, %133 : vector<8x128xf32>
    %135 = arith.negf %134 : vector<8x128xf32>
    %136 = math.exp %135 : vector<8x128xf32>
    %cst_35 = arith.constant 1.000000e+00 : f32
    %137 = vector.broadcast %cst_35 : f32 to vector<8x128xf32>
    %138 = arith.addf %137, %136 : vector<8x128xf32>
    %139 = arith.divf %137, %138 : vector<8x128xf32>
    %140 = vector.extract_strided_slice %130 {offsets = [0, 128], sizes = [8, 128], strides = [1, 1]} : vector<8x384xf32> to vector<8x128xf32>
    %141 = vector.extract_strided_slice %131 {offsets = [0, 128], sizes = [8, 128], strides = [1, 1]} : vector<8x384xf32> to vector<8x128xf32>
    %142 = arith.addf %140, %141 : vector<8x128xf32>
    %143 = arith.negf %142 : vector<8x128xf32>
    %144 = math.exp %143 : vector<8x128xf32>
    %cst_36 = arith.constant 1.000000e+00 : f32
    %145 = vector.broadcast %cst_36 : f32 to vector<8x128xf32>
    %146 = arith.addf %145, %144 : vector<8x128xf32>
    %147 = arith.divf %145, %146 : vector<8x128xf32>
    %148 = vector.extract_strided_slice %130 {offsets = [0, 256], sizes = [8, 128], strides = [1, 1]} : vector<8x384xf32> to vector<8x128xf32>
    %149 = vector.extract_strided_slice %131 {offsets = [0, 256], sizes = [8, 128], strides = [1, 1]} : vector<8x384xf32> to vector<8x128xf32>
    %150 = vector.broadcast %1 : vector<1x128xf32> to vector<8x128xf32>
    %151 = arith.addf %149, %150 : vector<8x128xf32>
    %152 = arith.mulf %139, %151 : vector<8x128xf32>
    %153 = arith.addf %148, %152 : vector<8x128xf32>
    %154 = math.tanh %153 : vector<8x128xf32>
    %cst_37 = arith.constant 1.000000e+00 : f32
    %155 = vector.broadcast %cst_37 : f32 to vector<8x128xf32>
    %156 = arith.subf %155, %147 : vector<8x128xf32>
    %157 = arith.mulf %156, %154 : vector<8x128xf32>
    %158 = arith.mulf %147, %129 : vector<8x128xf32>
    %159 = arith.addf %157, %158 : vector<8x128xf32>
    %c40 = arith.constant 40 : index
    %c0_38 = arith.constant 0 : index
    %160 = vector.load %arg6[%c40, %c0_38] : memref<64x384xf32, #tpu.memory_space<vmem>>, vector<8x384xf32>
    %cst_39 = arith.constant dense<0.000000e+00> : vector<8x384xf32>
    %161 = tpu.matmul %159, %0, %cst_39 {dimension_numbers = #tpu.dot_dimension_numbers<[1], [0], [0], [1], [0, 0, 1, 1], [], []>} : vector<8x128xf32>, vector<128x384xf32>, vector<8x384xf32> -> vector<8x384xf32>
    %162 = vector.extract_strided_slice %160 {offsets = [0, 0], sizes = [8, 128], strides = [1, 1]} : vector<8x384xf32> to vector<8x128xf32>
    %163 = vector.extract_strided_slice %161 {offsets = [0, 0], sizes = [8, 128], strides = [1, 1]} : vector<8x384xf32> to vector<8x128xf32>
    %164 = arith.addf %162, %163 : vector<8x128xf32>
    %165 = arith.negf %164 : vector<8x128xf32>
    %166 = math.exp %165 : vector<8x128xf32>
    %cst_40 = arith.constant 1.000000e+00 : f32
    %167 = vector.broadcast %cst_40 : f32 to vector<8x128xf32>
    %168 = arith.addf %167, %166 : vector<8x128xf32>
    %169 = arith.divf %167, %168 : vector<8x128xf32>
    %170 = vector.extract_strided_slice %160 {offsets = [0, 128], sizes = [8, 128], strides = [1, 1]} : vector<8x384xf32> to vector<8x128xf32>
    %171 = vector.extract_strided_slice %161 {offsets = [0, 128], sizes = [8, 128], strides = [1, 1]} : vector<8x384xf32> to vector<8x128xf32>
    %172 = arith.addf %170, %171 : vector<8x128xf32>
    %173 = arith.negf %172 : vector<8x128xf32>
    %174 = math.exp %173 : vector<8x128xf32>
    %cst_41 = arith.constant 1.000000e+00 : f32
    %175 = vector.broadcast %cst_41 : f32 to vector<8x128xf32>
    %176 = arith.addf %175, %174 : vector<8x128xf32>
    %177 = arith.divf %175, %176 : vector<8x128xf32>
    %178 = vector.extract_strided_slice %160 {offsets = [0, 256], sizes = [8, 128], strides = [1, 1]} : vector<8x384xf32> to vector<8x128xf32>
    %179 = vector.extract_strided_slice %161 {offsets = [0, 256], sizes = [8, 128], strides = [1, 1]} : vector<8x384xf32> to vector<8x128xf32>
    %180 = vector.broadcast %1 : vector<1x128xf32> to vector<8x128xf32>
    %181 = arith.addf %179, %180 : vector<8x128xf32>
    %182 = arith.mulf %169, %181 : vector<8x128xf32>
    %183 = arith.addf %178, %182 : vector<8x128xf32>
    %184 = math.tanh %183 : vector<8x128xf32>
    %cst_42 = arith.constant 1.000000e+00 : f32
    %185 = vector.broadcast %cst_42 : f32 to vector<8x128xf32>
    %186 = arith.subf %185, %177 : vector<8x128xf32>
    %187 = arith.mulf %186, %184 : vector<8x128xf32>
    %188 = arith.mulf %177, %159 : vector<8x128xf32>
    %189 = arith.addf %187, %188 : vector<8x128xf32>
    %c48 = arith.constant 48 : index
    %c0_43 = arith.constant 0 : index
    %190 = vector.load %arg6[%c48, %c0_43] : memref<64x384xf32, #tpu.memory_space<vmem>>, vector<8x384xf32>
    %cst_44 = arith.constant dense<0.000000e+00> : vector<8x384xf32>
    %191 = tpu.matmul %189, %0, %cst_44 {dimension_numbers = #tpu.dot_dimension_numbers<[1], [0], [0], [1], [0, 0, 1, 1], [], []>} : vector<8x128xf32>, vector<128x384xf32>, vector<8x384xf32> -> vector<8x384xf32>
    %192 = vector.extract_strided_slice %190 {offsets = [0, 0], sizes = [8, 128], strides = [1, 1]} : vector<8x384xf32> to vector<8x128xf32>
    %193 = vector.extract_strided_slice %191 {offsets = [0, 0], sizes = [8, 128], strides = [1, 1]} : vector<8x384xf32> to vector<8x128xf32>
    %194 = arith.addf %192, %193 : vector<8x128xf32>
    %195 = arith.negf %194 : vector<8x128xf32>
    %196 = math.exp %195 : vector<8x128xf32>
    %cst_45 = arith.constant 1.000000e+00 : f32
    %197 = vector.broadcast %cst_45 : f32 to vector<8x128xf32>
    %198 = arith.addf %197, %196 : vector<8x128xf32>
    %199 = arith.divf %197, %198 : vector<8x128xf32>
    %200 = vector.extract_strided_slice %190 {offsets = [0, 128], sizes = [8, 128], strides = [1, 1]} : vector<8x384xf32> to vector<8x128xf32>
    %201 = vector.extract_strided_slice %191 {offsets = [0, 128], sizes = [8, 128], strides = [1, 1]} : vector<8x384xf32> to vector<8x128xf32>
    %202 = arith.addf %200, %201 : vector<8x128xf32>
    %203 = arith.negf %202 : vector<8x128xf32>
    %204 = math.exp %203 : vector<8x128xf32>
    %cst_46 = arith.constant 1.000000e+00 : f32
    %205 = vector.broadcast %cst_46 : f32 to vector<8x128xf32>
    %206 = arith.addf %205, %204 : vector<8x128xf32>
    %207 = arith.divf %205, %206 : vector<8x128xf32>
    %208 = vector.extract_strided_slice %190 {offsets = [0, 256], sizes = [8, 128], strides = [1, 1]} : vector<8x384xf32> to vector<8x128xf32>
    %209 = vector.extract_strided_slice %191 {offsets = [0, 256], sizes = [8, 128], strides = [1, 1]} : vector<8x384xf32> to vector<8x128xf32>
    %210 = vector.broadcast %1 : vector<1x128xf32> to vector<8x128xf32>
    %211 = arith.addf %209, %210 : vector<8x128xf32>
    %212 = arith.mulf %199, %211 : vector<8x128xf32>
    %213 = arith.addf %208, %212 : vector<8x128xf32>
    %214 = math.tanh %213 : vector<8x128xf32>
    %cst_47 = arith.constant 1.000000e+00 : f32
    %215 = vector.broadcast %cst_47 : f32 to vector<8x128xf32>
    %216 = arith.subf %215, %207 : vector<8x128xf32>
    %217 = arith.mulf %216, %214 : vector<8x128xf32>
    %218 = arith.mulf %207, %189 : vector<8x128xf32>
    %219 = arith.addf %217, %218 : vector<8x128xf32>
    %c56 = arith.constant 56 : index
    %c0_48 = arith.constant 0 : index
    %220 = vector.load %arg6[%c56, %c0_48] : memref<64x384xf32, #tpu.memory_space<vmem>>, vector<8x384xf32>
    %cst_49 = arith.constant dense<0.000000e+00> : vector<8x384xf32>
    %221 = tpu.matmul %219, %0, %cst_49 {dimension_numbers = #tpu.dot_dimension_numbers<[1], [0], [0], [1], [0, 0, 1, 1], [], []>} : vector<8x128xf32>, vector<128x384xf32>, vector<8x384xf32> -> vector<8x384xf32>
    %222 = vector.extract_strided_slice %220 {offsets = [0, 0], sizes = [8, 128], strides = [1, 1]} : vector<8x384xf32> to vector<8x128xf32>
    %223 = vector.extract_strided_slice %221 {offsets = [0, 0], sizes = [8, 128], strides = [1, 1]} : vector<8x384xf32> to vector<8x128xf32>
    %224 = arith.addf %222, %223 : vector<8x128xf32>
    %225 = arith.negf %224 : vector<8x128xf32>
    %226 = math.exp %225 : vector<8x128xf32>
    %cst_50 = arith.constant 1.000000e+00 : f32
    %227 = vector.broadcast %cst_50 : f32 to vector<8x128xf32>
    %228 = arith.addf %227, %226 : vector<8x128xf32>
    %229 = arith.divf %227, %228 : vector<8x128xf32>
    %230 = vector.extract_strided_slice %220 {offsets = [0, 128], sizes = [8, 128], strides = [1, 1]} : vector<8x384xf32> to vector<8x128xf32>
    %231 = vector.extract_strided_slice %221 {offsets = [0, 128], sizes = [8, 128], strides = [1, 1]} : vector<8x384xf32> to vector<8x128xf32>
    %232 = arith.addf %230, %231 : vector<8x128xf32>
    %233 = arith.negf %232 : vector<8x128xf32>
    %234 = math.exp %233 : vector<8x128xf32>
    %cst_51 = arith.constant 1.000000e+00 : f32
    %235 = vector.broadcast %cst_51 : f32 to vector<8x128xf32>
    %236 = arith.addf %235, %234 : vector<8x128xf32>
    %237 = arith.divf %235, %236 : vector<8x128xf32>
    %238 = vector.extract_strided_slice %220 {offsets = [0, 256], sizes = [8, 128], strides = [1, 1]} : vector<8x384xf32> to vector<8x128xf32>
    %239 = vector.extract_strided_slice %221 {offsets = [0, 256], sizes = [8, 128], strides = [1, 1]} : vector<8x384xf32> to vector<8x128xf32>
    %240 = vector.broadcast %1 : vector<1x128xf32> to vector<8x128xf32>
    %241 = arith.addf %239, %240 : vector<8x128xf32>
    %242 = arith.mulf %229, %241 : vector<8x128xf32>
    %243 = arith.addf %238, %242 : vector<8x128xf32>
    %244 = math.tanh %243 : vector<8x128xf32>
    %cst_52 = arith.constant 1.000000e+00 : f32
    %245 = vector.broadcast %cst_52 : f32 to vector<8x128xf32>
    %246 = arith.subf %245, %237 : vector<8x128xf32>
    %247 = arith.mulf %246, %244 : vector<8x128xf32>
    %248 = arith.mulf %237, %219 : vector<8x128xf32>
    %249 = arith.addf %247, %248 : vector<8x128xf32>
    %250 = vector.extract_strided_slice %249 {offsets = [0, 0], sizes = [2, 32], strides = [1, 1]} : vector<8x128xf32> to vector<2x32xf32>
    %c0_53 = arith.constant 0 : index
    %c0_54 = arith.constant 0 : index
    %251 = vector.load %arg5[%c0_53, %c0_54] : memref<2x32xf32, #tpu.memory_space<vmem>>, vector<2x32xf32>
    tpu.vector_store %arg5[%c0_53, %c0_54], %250 {strides = array<i32>} : memref<2x32xf32, #tpu.memory_space<vmem>>, vector<2x32xf32>,
    return
  }
}

</mosaic_0001>

<bundles_post_ra>
// kernel: tpu_custom_call.1
= control target key start
LH: loop header
LB: loop body
LE: loop exit
PB: predicated region body
PF: predicated region fallthrough
CT: control target
= control target key end

     0   :  { %10 = vsyncpa [#allocation4], 0  ;;  %s2259_s0 = inlined_call_operand.vmem [shape: f32[64,18], index: 0, kind: input, shape index: {}]   ;;  %s2260_s1 = inlined_call_operand.vmem [shape: f32[18,384], index: 1, kind: input, shape index: {}]   ;;  %s2261_s2 = inlined_call_operand.hbm [shape: f32[128,384], index: 2, kind: input, shape index: {}]   ;;  %s2262_s3 = inlined_call_operand.vmem [shape: f32[1,384], index: 3, kind: input, shape index: {}]   ;;  %s2263_s4 = inlined_call_operand.vmem [shape: f32[1,128], index: 4, kind: input, shape index: {}]   ;;  %s2264_s5 = inlined_call_operand.hbm [shape: f32[2,32], index: 5, kind: output, shape index: {}]  }
   0x1   :  { %11 = vsyncpa [#allocation5], 0  ;;  %s20_s20 = sshll.u32 %s2261_s2, 4  ;;  %s1439_s21 = smov [#allocation3]   ;;  %s21_s20 = int_to_ptr.hbm [resolvable:$true] %s20_s20 }
   0x2   :  { %s22_s22 = sshll.u32 %s1439_s21, 4  ;;  %s1440_s23 = smov 384   ;;  %s23_s22 = int_to_ptr.vmem [resolvable:$true] %s22_s22 }
   0x3   :  { %s1441_s24 = smov 24  }
   0x4   :  { %28 = dma.hbm_to_vmem [thread:$0]  %s21_s20, 6144, %s23_s22, [#allocation4], %s1440_s23, %s1440_s23, %s1441_s24  }
   0x5   :  { %1435 = dma.done.wait [#allocation4], 6144  }
   0x6   :  { %1436 = vsyncadd [#allocation4], 4294961152  ;;  %vm136_vm0 = vcmask 1041408   ;;  %v1477_v0 = vld [vmem:[#allocation3 + $0x168] sm:$0xff]  ;;  %v1479_v1 = vld [vmem:[#allocation3 + $0x150] sm:$0xff]  ;;  %vm111_vm1 = vcmask 146432  }
   0x7   :  { %v100_v2 = vld [vmem:[%s2260_s1 + $0x30] sm:$0x3]  ;;  %296 = vmatpush.msra.mxu3 %v1477_v0  ;;  %v97_v3 = vld [vmem:[%s2260_s1 + $0x18] sm:$0xff]  ;;  %v94_v5 = vld [vmem:[%s2260_s1] sm:$0xff]  ;;  %v1442_v44 = vmov 0.0   ;;  %s1193_s13 = sshll.u32 %s2264_s5, 4  ;;  %s1194_s13 = int_to_ptr.hbm [resolvable:$true] %s1193_s13 }
   0x8   :  { %1203 = vmatpush.msk.msra.mxu0 %vm136_vm0, %v100_v2  ;;  %v1489_v4 = vld [vmem:[#allocation3 + $0x138] sm:$0xff]  ;;  %1246 = vmatpush.msk.msra.mxu2 %vm136_vm0, %v100_v2  ;;  %v1499_v6 = vld [vmem:[%s2259_s0] sm:$0xff]  ;;  %v1504_v8 = vld [vmem:[#allocation3 + $0x108] sm:$0xff] }
   0x9   :  { %297 = vmatpush.msra.mxu3 %v1479_v1  ;;  %v1501_v7 = vld [vmem:[#allocation3 + $0x120] sm:$0xff]  ;;  %v1509_v9 = vld [vmem:[#allocation3 + $0x178] sm:$0xff]  ;;  %v1511_v10 = vld [vmem:[#allocation3 + $0xf0] sm:$0xff] }
   0xa   :  { %160 = vmatpush.msra.mxu0 %v97_v3  ;;  %1247 = vmatpush.msra.mxu2 %v97_v3  ;;  %v1515_v11 = vld [vmem:[#allocation3 + $0x160] sm:$0xff]  ;;  %v1517_v12 = vld [vmem:[#allocation3 + $0x148] sm:$0xff]  ;;  %v1519_v13 = vld [vmem:[#allocation3 + $0xd8] sm:$0xff] }
   0xb   :  { %298 = vmatpush.msra.mxu3 %v1489_v4  ;;  %v1526_v14 = vld [vmem:[%s2259_s0 + $0x8] sm:$0xff]  ;;  %v1528_v15 = vld [vmem:[#allocation3 + $0xc0] sm:$0xff]  ;;  %v1531_v16 = vld [vmem:[#allocation3 + $0x130] sm:$0xff] }
   0xc   :  { %161 = vmatpush.msra.mxu0 %v94_v5  ;;  %1248 = vmatpush.msra.mxu2 %v94_v5  ;;  %v1537_v17 = vld [vmem:[%s2259_s0 + $0x38] sm:$0xff]  ;;  %v1539_v18 = vld [vmem:[#allocation3 + $0xa8] sm:$0xff]  ;;  %v1549_v20 = vld [vmem:[#allocation3 + $0x90] sm:$0xff] }
   0xd   :  { %1204 = vmatmul.msk.f32.vlgmr.msra.gmra.mxu0 %vm111_vm1, %v1499_v6  ;;  %299 = vmatpush.msra.mxu3 %v1501_v7  ;;  %v1543_v19 = vld [vmem:[#allocation3 + $0x118] sm:$0xff]  ;;  %v1551_v21 = vld [vmem:[#allocation3 + $0x100] sm:$0xff]  ;;  %v1560_v24 = vld [vmem:[#allocation3 + $0xe8] sm:$0xff] }
   0xe   :  { %336 = vmatpush.msrb.mxu0 %v1509_v9  ;;  %1211 = vmatmul.msk.f32.vlgmr.msra.gmra.mxu2 %vm111_vm1, %v1537_v17  ;;  %v101_v22 = vld [vmem:[%s2260_s1 + $0x38] sm:$0x3]  ;;  %v1568_v25 = vld [vmem:[%s2259_s0 + $0x10] sm:$0xff]  ;;  %v98_v26 = vld [vmem:[%s2260_s1 + $0x20] sm:$0xff] }
   0xf   :  { %300 = vmatpush.msra.mxu3 %v1504_v8  ;;  %v1558_v23 = vld [vmem:[#allocation3 + $0x78] sm:$0xff]  ;;  %1249 = vmatpush.msk.msrb.mxu2 %vm136_vm0, %v101_v22  ;;  %v1574_v27 = vld [vmem:[#allocation3 + $0x60] sm:$0xff]  ;;  %v1576_v28 = vld [vmem:[#allocation3 + $0xd0] sm:$0xff] }
  0x10   :  { %337 = vmatpush.msrb.mxu0 %v1515_v11  ;;  %1212 = vmatpush.msk.msra.mxu1 %vm136_vm0, %v101_v22  ;;  %v95_v29 = vld [vmem:[%s2260_s1 + $0x8] sm:$0xff]  ;;  %v1587_v31 = vld [vmem:[#allocation3 + $0xb8] sm:$0xff]  ;;  %v1591_v32 = vld [vmem:[#allocation3 + $0x30] sm:$0xff] }
  0x11   :  { %301 = vmatpush.msra.mxu3 %v1511_v10  ;;  %1250 = vmatpush.msrb.mxu2 %v98_v26  ;;  %v1583_v30 = vld [vmem:[#allocation3 + $0x48] sm:$0xff]  ;;  %2285 = vst [vmem:[#allocation9_spill] sm:$0xff] %v1591_v32  ;;  %v1593_v33 = vld [vmem:[#allocation3 + $0xa0] sm:$0xff]  ;;  %v1602_v35 = vld [vmem:[#allocation3 + $0x18] sm:$0xff] }
  0x12   :  { %338 = vmatpush.msrb.mxu0 %v1517_v12  ;;  %201 = vmatpush.msra.mxu1 %v98_v26  ;;  %v102_v34 = vld [vmem:[%s2260_s1 + $0x40] sm:$0x3]  ;;  %2286 = vst [vmem:[#allocation10_spill] sm:$0xff] %v1602_v35  ;;  %v1604_v36 = vld [vmem:[#allocation3 + $0x88] sm:$0xff]  ;;  %v1613_v37 = vld [vmem:[%s2259_s0 + $0x18] sm:$0xff] }
  0x13   :  { %302 = vmatpush.msra.mxu3 %v1519_v13  ;;  %1251 = vmatpush.msrb.mxu2 %v95_v29  ;;  %v99_v38 = vld [vmem:[%s2260_s1 + $0x28] sm:$0xff]  ;;  %v1619_v39 = vld [vmem:[#allocation3] sm:$0xff]  ;;  %v1621_v40 = vld [vmem:[#allocation3 + $0x70] sm:$0xff] }
  0x14   :  { %339 = vmatpush.msrb.mxu0 %v1531_v16  ;;  %202 = vmatpush.msra.mxu1 %v95_v29  ;;  %2287 = vst [vmem:[#allocation11_spill] sm:$0xff] %v1619_v39  ;;  %v96_v41 = vld [vmem:[%s2260_s1 + $0x10] sm:$0xff]  ;;  %v1633_v43 = vld [vmem:[#allocation3 + $0x58] sm:$0xff]  ;;  %v1640_v46 = vld [vmem:[#allocation3 + $0x40] sm:$0xff] }
  0x15   :  { %1205 = vmatmul.msk.f32.gmra.mxu0 %vm111_vm1, %v1526_v14  ;;  %303 = vmatpush.msra.mxu3 %v1528_v15  ;;  %v1629_v42 = vld [vmem:[#allocation3 + $0x170] sm:$0xff]  ;;  %v1638_v45 = vld [vmem:[#allocation3 + $0x158] sm:$0xff]  ;;  %2288 = vst [vmem:[#allocation12_spill] sm:$0xff] %v1640_v46  ;;  %v1646_v47 = vld [vmem:[#allocation3 + $0x140] sm:$0xff] }
  0x16   :  { %340 = vmatpush.msrb.mxu0 %v1543_v19  ;;  %1220 = vmatmul.msk.f32.vlgmr.msrb.gmra.mxu2 %vm111_vm1, %v1537_v17  ;;  %v1648_v48 = vld [vmem:[#allocation3 + $0x28] sm:$0xff]  ;;  %v1656_v49 = vld [vmem:[%s2259_s0 + $0x20] sm:$0xff]  ;;  %v1661_v51 = vld [vmem:[#allocation3 + $0x10] sm:$0xff] }
  0x17   :  { %304 = vmatpush.msra.mxu3 %v1539_v18  ;;  %1221 = vmatpush.msk.msra.mxu2 %vm136_vm0, %v102_v34  ;;  %2289 = vst [vmem:[#allocation13_spill] sm:$0xff] %v1648_v48  ;;  %v1659_v50 = vld [vmem:[#allocation3 + $0x128] sm:$0xff]  ;;  %v1667_v52 = vld [vmem:[#allocation3 + $0x110] sm:$0xff]  ;;  %v1674_v53 = vld [vmem:[#allocation3 + $0xf8] sm:$0xff] }
  0x18   :  { %341 = vmatpush.msrb.mxu0 %v1551_v21  ;;  %1213 = vmatmul.msk.f32.vlgmr.msra.gmra.mxu1 %vm111_vm1, %v1499_v6  ;;  %2290 = vst [vmem:[#allocation14_spill] sm:$0xff] %v1661_v51  ;;  %v1682_v54 = vld [vmem:[#allocation3 + $0xe0] sm:$0xff]  ;;  %v1690_v55 = vld [vmem:[%s2259_s0 + $0x28] sm:$0xff]  ;;  %v1699_v57 = vld [vmem:[#allocation3 + $0xb0] sm:$0xff] }
  0x19   :  { %305 = vmatpush.msra.mxu3 %v1549_v20  ;;  %242 = vmatpush.msra.mxu2 %v99_v38  ;;  %v1693_v56 = vld [vmem:[#allocation3 + $0xc8] sm:$0xff]  ;;  %v1706_v58 = vld [vmem:[#allocation3 + $0x98] sm:$0xff]  ;;  %v1714_v59 = vld [vmem:[#allocation3 + $0x80] sm:$0xff] }
  0x1a   :  { %342 = vmatpush.msrb.mxu0 %v1560_v24  ;;  %410 = vmatpush.msrb.mxu1 %v1477_v0  ;;  %v1722_v60 = vld [vmem:[%s2259_s0 + $0x30] sm:$0xff]  ;;  %v1725_v61 = vld [vmem:[#allocation3 + $0x68] sm:$0xff]  ;;  %v1738_v63 = vld [vmem:[#allocation3 + $0x38] sm:$0xff] }
  0x1b   :  { %306 = vmatpush.msra.mxu3 %v1558_v23  ;;  %243 = vmatpush.msra.mxu2 %v96_v41  ;;  %v1731_v62 = vld [vmem:[#allocation3 + $0x50] sm:$0xff]  ;;  %2292 = vst [vmem:[#allocation16_spill] sm:$0xff] %v1738_v63  ;;  %v1746_v2 = vld [vmem:[#allocation3 + $0x20] sm:$0xff]  ;;  %v1752_v3 = vld [vmem:[#allocation3 + $0x8] sm:$0xff] }
  0x1c   :  { %343 = vmatpush.msrb.mxu0 %v1576_v28  ;;  %411 = vmatpush.msrb.mxu1 %v1479_v1  ;;  %2291 = vst [vmem:[#allocation15_spill] sm:$0xff] %v1731_v62 }
  0x1d   :  { %1206 = vmatmul.msk.f32.gmra.mxu0 %vm111_vm1, %v1568_v25  ;;  %307 = vmatpush.msra.mxu3 %v1574_v27  ;;  %2293 = vst [vmem:[#allocation17_spill] sm:$0xff] %v1746_v2 }
  0x1e   :  { %344 = vmatpush.msrb.mxu0 %v1587_v31  ;;  %1222 = vmatmul.msk.f32.vlgmr.msra.gmra.mxu2 %vm111_vm1, %v1499_v6  ;;  %2294 = vst [vmem:[#allocation18_spill] sm:$0xff] %v1752_v3  ;;  %v103_v6 = vld [vmem:[%s2262_s3] sm:$0x7] }
  0x1f   :  { %308 = vmatpush.msra.mxu3 %v1583_v30  ;;  %430 = vmatpush.msrb.mxu2 %v1629_v42 }
  0x20   :  { %345 = vmatpush.msrb.mxu0 %v1593_v33  ;;  %412 = vmatpush.msrb.mxu1 %v1489_v4 }
  0x21   :  { %309 = vmatpush.msra.mxu3 %v1591_v32  ;;  %431 = vmatpush.msrb.mxu2 %v1638_v45 }
  0x22   :  { %346 = vmatpush.msrb.mxu0 %v1604_v36  ;;  %1214 = vmatmul.msk.f32.gmra.mxu1 %vm111_vm1, %v1526_v14 }
  0x23   :  { %310 = vmatpush.msra.mxu3 %v1602_v35  ;;  %432 = vmatpush.msrb.mxu2 %v1646_v47 }
  0x24   :  { %347 = vmatpush.msrb.mxu0 %v1621_v40  ;;  %413 = vmatpush.msrb.mxu1 %v1501_v7 }
  0x25   :  { %1207 = vmatmul.msk.f32.gmra.mxu0 %vm111_vm1, %v1613_v37  ;;  %311 = vmatpush.msra.mxu3 %v1619_v39 }
  0x26   :  { %312 = vmatmul.f32.vlgmr.msra.gmra.mxu3 %v1442_v44  ;;  %348 = vmatpush.msrb.mxu0 %v1633_v43 }
  0x27   :  { %316 = vmatpush.msrb.mxu3 %v1629_v42  ;;  %1223 = vmatmul.msk.f32.gmra.mxu2 %vm111_vm1, %v1526_v14  ;;  %v105_v14 = vperm.slane %v103_v6, 0 }
  0x28   :  { %349 = vmatpush.msrb.mxu0 %v1640_v46  ;;  %433 = vmatpush.msrb.mxu2 %v1659_v50 }
  0x29   :  { %317 = vmatpush.msrb.mxu3 %v1638_v45  ;;  %414 = vmatpush.msrb.mxu1 %v1504_v8 }
  0x2a   :  { %350 = vmatpush.msrb.mxu0 %v1648_v48  ;;  %434 = vmatpush.msrb.mxu2 %v1667_v52 }
  0x2b   :  { %318 = vmatpush.msrb.mxu3 %v1646_v47  ;;  %415 = vmatpush.msrb.mxu1 %v1511_v10 }
  0x2c   :  { %351 = vmatpush.msrb.mxu0 %v1661_v51  ;;  %435 = vmatpush.msrb.mxu2 %v1674_v53 }
  0x2d   :  { %1208 = vmatmul.msk.f32.gmra.mxu0 %vm111_vm1, %v1656_v49  ;;  %319 = vmatpush.msrb.mxu3 %v1659_v50 }
  0x2e   :  { %521 = vmatpush.msra.mxu0 %v1477_v0  ;;  %436 = vmatpush.msrb.mxu2 %v1682_v54 }
  0x2f   :  { %320 = vmatpush.msrb.mxu3 %v1667_v52  ;;  %1224 = vmatmul.msk.f32.gmra.mxu2 %vm111_vm1, %v1568_v25 }
  0x30   :  { %522 = vmatpush.msra.mxu0 %v1479_v1  ;;  %1215 = vmatmul.msk.f32.gmra.mxu1 %vm111_vm1, %v1568_v25 }
  0x31   :  { %321 = vmatpush.msrb.mxu3 %v1674_v53  ;;  %416 = vmatpush.msrb.mxu1 %v1519_v13 }
  0x32   :  { %437 = vmatpush.msrb.mxu2 %v1693_v56  ;;  %523 = vmatpush.msra.mxu0 %v1489_v4 }
  0x33   :  { %322 = vmatpush.msrb.mxu3 %v1682_v54  ;;  %417 = vmatpush.msrb.mxu1 %v1528_v15 }
  0x34   :  { %438 = vmatpush.msrb.mxu2 %v1699_v57  ;;  %524 = vmatpush.msra.mxu0 %v1501_v7 }
  0x35   :  { %1209 = vmatmul.msk.f32.gmra.mxu0 %vm111_vm1, %v1690_v55  ;;  %323 = vmatpush.msrb.mxu3 %v1693_v56 }
  0x36   :  { %418 = vmatpush.msrb.mxu1 %v1539_v18  ;;  %439 = vmatpush.msrb.mxu2 %v1706_v58 }
  0x37   :  { %324 = vmatpush.msrb.mxu3 %v1699_v57  ;;  %1225 = vmatmul.msk.f32.gmra.mxu2 %vm111_vm1, %v1613_v37 }
  0x38   :  { %419 = vmatpush.msrb.mxu1 %v1549_v20  ;;  %440 = vmatpush.msrb.mxu2 %v1714_v59 }
  0x39   :  { %325 = vmatpush.msrb.mxu3 %v1706_v58  ;;  %1216 = vmatmul.msk.f32.gmra.mxu1 %vm111_vm1, %v1613_v37 }
  0x3a   :  { %420 = vmatpush.msrb.mxu1 %v1558_v23  ;;  %525 = vmatpush.msra.mxu0 %v1504_v8 }
  0x3b   :  { %326 = vmatpush.msrb.mxu3 %v1714_v59  ;;  %441 = vmatpush.msrb.mxu2 %v1725_v61 }
  0x3c   :  { %421 = vmatpush.msrb.mxu1 %v1574_v27  ;;  %526 = vmatpush.msra.mxu0 %v1511_v10 }
  0x3d   :  { %1210 = vmatmul.msk.f32.gmra.mxu0 %vm111_vm1, %v1722_v60  ;;  %327 = vmatpush.msrb.mxu3 %v1725_v61 }
  0x3e   :  { %422 = vmatpush.msrb.mxu1 %v1583_v30  ;;  %442 = vmatpush.msrb.mxu2 %v1731_v62 }
  0x3f   :  { %328 = vmatpush.msrb.mxu3 %v1731_v62  ;;  %1226 = vmatmul.msk.f32.gmra.mxu2 %vm111_vm1, %v1656_v49 }
  0x40   :  { %423 = vmatpush.msrb.mxu1 %v1591_v32  ;;  %443 = vmatpush.msrb.mxu2 %v1738_v63 }
  0x41   :  { %329 = vmatpush.msrb.mxu3 %v1738_v63  ;;  %1217 = vmatmul.msk.f32.gmra.mxu1 %vm111_vm1, %v1656_v49 }
  0x42   :  { %424 = vmatpush.msrb.mxu1 %v1602_v35  ;;  %527 = vmatpush.msra.mxu0 %v1519_v13 }
  0x43   :  { %330 = vmatpush.msrb.mxu3 %v1746_v2  ;;  %444 = vmatpush.msrb.mxu2 %v1746_v2 }
  0x44   :  { %425 = vmatpush.msrb.mxu1 %v1619_v39  ;;  %528 = vmatpush.msra.mxu0 %v1528_v15 }
  0x45   :  { %352 = vmatmul.f32.vlgmr.msrb.gmra.mxu0 %v1442_v44  ;;  %331 = vmatpush.msrb.mxu3 %v1752_v3 }
  0x46   :  { %332 = vmatmul.f32.vlgmr.msrb.gmra.mxu3 %v1442_v44  ;;  %541 = vmatpush.msra.mxu1 %v1629_v42 }
  0x47   :  { %450 = vmatpush.msra.mxu3 %v1509_v9  ;;  %445 = vmatpush.msrb.mxu2 %v1752_v3 }
  0x48   :  { %1227 = vmatmul.msk.f32.gmra.mxu2 %vm111_vm1, %v1690_v55  ;;  %542 = vmatpush.msra.mxu1 %v1638_v45 }
  0x49   :  { %451 = vmatpush.msra.mxu3 %v1515_v11  ;;  %561 = vmatpush.msra.mxu2 %v1509_v9 }
  0x4a   :  { %1218 = vmatmul.msk.f32.gmra.mxu1 %vm111_vm1, %v1690_v55  ;;  %529 = vmatpush.msra.mxu0 %v1539_v18 }
  0x4b   :  { %452 = vmatpush.msra.mxu3 %v1517_v12  ;;  %562 = vmatpush.msra.mxu2 %v1515_v11 }
  0x4c   :  { %543 = vmatpush.msra.mxu1 %v1646_v47  ;;  %530 = vmatpush.msra.mxu0 %v1549_v20 }
  0x4d   :  { %453 = vmatpush.msra.mxu3 %v1531_v16  ;;  %563 = vmatpush.msra.mxu2 %v1517_v12 }
  0x4e   :  { %544 = vmatpush.msra.mxu1 %v1659_v50  ;;  %531 = vmatpush.msra.mxu0 %v1558_v23 }
  0x4f   :  { %454 = vmatpush.msra.mxu3 %v1543_v19  ;;  %564 = vmatpush.msra.mxu2 %v1531_v16 }
  0x50   :  { %545 = vmatpush.msra.mxu1 %v1667_v52  ;;  %1228 = vmatmul.msk.f32.gmra.mxu2 %vm111_vm1, %v1722_v60 }
  0x51   :  { %455 = vmatpush.msra.mxu3 %v1551_v21  ;;  %565 = vmatpush.msra.mxu2 %v1543_v19 }
  0x52   :  { %546 = vmatpush.msra.mxu1 %v1674_v53  ;;  %532 = vmatpush.msra.mxu0 %v1574_v27 }
  0x53   :  { %456 = vmatpush.msra.mxu3 %v1560_v24  ;;  %1219 = vmatmul.msk.f32.gmra.mxu1 %vm111_vm1, %v1722_v60 }
  0x54   :  { %547 = vmatpush.msra.mxu1 %v1682_v54  ;;  %566 = vmatpush.msra.mxu2 %v1551_v21 }
  0x55   :  { %457 = vmatpush.msra.mxu3 %v1576_v28  ;;  %533 = vmatpush.msra.mxu0 %v1583_v30 }
  0x56   :  { %548 = vmatpush.msra.mxu1 %v1693_v56  ;;  %567 = vmatpush.msra.mxu2 %v1560_v24 }
  0x57   :  { %458 = vmatpush.msra.mxu3 %v1587_v31  ;;  %534 = vmatpush.msra.mxu0 %v1591_v32 }
  0x58   :  { %549 = vmatpush.msra.mxu1 %v1699_v57  ;;  %1229 = vmatmul.msk.f32.gmra.mxu2 %vm111_vm1, %v1537_v17 }
  0x59   :  { %459 = vmatpush.msra.mxu3 %v1593_v33  ;;  %568 = vmatpush.msra.mxu2 %v1576_v28 }
  0x5a   :  { %550 = vmatpush.msra.mxu1 %v1706_v58  ;;  %535 = vmatpush.msra.mxu0 %v1602_v35 }
  0x5b   :  { %460 = vmatpush.msra.mxu3 %v1604_v36  ;;  %569 = vmatpush.msra.mxu2 %v1587_v31 }
  0x5c   :  { %551 = vmatpush.msra.mxu1 %v1714_v59  ;;  %536 = vmatpush.msra.mxu0 %v1619_v39 }
  0x5d   :  { %461 = vmatpush.msra.mxu3 %v1621_v40  ;;  %570 = vmatpush.msra.mxu2 %v1593_v33 }
  0x5e   :  { %552 = vmatpush.msra.mxu1 %v1725_v61  ;;  %652 = vmatpush.msrb.mxu0 %v1629_v42 }
  0x5f   :  { %462 = vmatpush.msra.mxu3 %v1633_v43  ;;  %571 = vmatpush.msra.mxu2 %v1604_v36 }
  0x60   :  { %553 = vmatpush.msra.mxu1 %v1731_v62  ;;  %653 = vmatpush.msrb.mxu0 %v1638_v45 }
  0x61   :  { %463 = vmatpush.msra.mxu3 %v1640_v46  ;;  %572 = vmatpush.msra.mxu2 %v1621_v40 }
  0x62   :  { %554 = vmatpush.msra.mxu1 %v1738_v63  ;;  %654 = vmatpush.msrb.mxu0 %v1646_v47 }
  0x63   :  { %464 = vmatpush.msra.mxu3 %v1648_v48  ;;  %573 = vmatpush.msra.mxu2 %v1633_v43 }
  0x64   :  { %555 = vmatpush.msra.mxu1 %v1746_v2  ;;  %655 = vmatpush.msrb.mxu0 %v1659_v50 }
  0x65   :  { %465 = vmatpush.msra.mxu3 %v1661_v51  ;;  %574 = vmatpush.msra.mxu2 %v1640_v46 }
  0x66   :  { %556 = vmatpush.msra.mxu1 %v1752_v3  ;;  %656 = vmatpush.msrb.mxu0 %v1667_v52 }
  0x67   :  { %632 = vmatpush.msrb.mxu3 %v1477_v0  ;;  %575 = vmatpush.msra.mxu2 %v1648_v48 }
  0x68   :  { %657 = vmatpush.msrb.mxu0 %v1674_v53 }
  0x69   :  { %633 = vmatpush.msrb.mxu3 %v1479_v1  ;;  %576 = vmatpush.msra.mxu2 %v1661_v51 }
  0x6a   :  { %658 = vmatpush.msrb.mxu0 %v1682_v54 }
  0x6b   :  { %634 = vmatpush.msrb.mxu3 %v1489_v4 }
  0x6c   :  { %659 = vmatpush.msrb.mxu0 %v1693_v56 }
  0x6d   :  { %635 = vmatpush.msrb.mxu3 %v1501_v7 }
  0x6e   :  { %660 = vmatpush.msrb.mxu0 %v1699_v57 }
  0x6f   :  { %636 = vmatpush.msrb.mxu3 %v1504_v8 }
  0x70   :  { %661 = vmatpush.msrb.mxu0 %v1706_v58 }
  0x71   :  { %637 = vmatpush.msrb.mxu3 %v1511_v10 }
  0x72   :  { %662 = vmatpush.msrb.mxu0 %v1714_v59 }
  0x73   :  { %638 = vmatpush.msrb.mxu3 %v1519_v13 }
  0x74   :  { %663 = vmatpush.msrb.mxu0 %v1725_v61 }
  0x75   :  { %639 = vmatpush.msrb.mxu3 %v1528_v15 }
  0x76   :  { %664 = vmatpush.msrb.mxu0 %v1731_v62 }
  0x77   :  { %640 = vmatpush.msrb.mxu3 %v1539_v18 }
  0x78   :  { %665 = vmatpush.msrb.mxu0 %v1738_v63 }
  0x79   :  { %641 = vmatpush.msrb.mxu3 %v1549_v20 }
  0x7a   :  { %666 = vmatpush.msrb.mxu0 %v1746_v2 }
  0x7b   :  { %642 = vmatpush.msrb.mxu3 %v1558_v23 }
  0x7c   :  { %667 = vmatpush.msrb.mxu0 %v1752_v3 }
  0x7d   :  { %643 = vmatpush.msrb.mxu3 %v1574_v27 }
  0x7f   :  { %644 = vmatpush.msrb.mxu3 %v1583_v30 }
  0x81   :  { %645 = vmatpush.msrb.mxu3 %v1591_v32 }
  0x83   :  { %646 = vmatpush.msrb.mxu3 %v1602_v35 }
  0x85   :  { %647 = vmatpush.msrb.mxu3 %v1619_v39 }
  0x8a   :  { %v163_v5 = vpop.f32.mrf.mxu0 }
  0x8b   :  { %v164_v41 = vadd.f32 %v163_v5, %v105_v14 }
  0x91   :  { %v184_v25 = vpop.f32.mrf.mxu2 }
  0x92   :  { %v166_v17 = vpop.f32.mrf.mxu0  ;;  %v1877_v26 = vadd.f32 %v184_v25, %v105_v14 }
  0x93   :  { %v1875_v22 = vadd.f32 %v166_v17, %v105_v14 }
  0x94   :  { %2296 = vst [vmem:[#allocation20_spill] sm:$0xff] %v1877_v26 }
  0x95   :  { %2295 = vst [vmem:[#allocation19_spill] sm:$0xff] %v1875_v22  ;;  %v204_v5 = vpop.f32.mrf.mxu1 }
  0x9a   :  { %v169_v29 = vpop.f32.mrf.mxu0 }
  0x9b   :  { %v1879_v34 = vadd.f32 %v169_v29, %v105_v14 }
  0x9d   :  { %2297 = vst [vmem:[#allocation21_spill] sm:$0xff] %v1879_v34 }
  0xa2   :  { %v172_v37 = vpop.f32.mrf.mxu0 }
  0xa3   :  { %v1881_v38 = vadd.f32 %v172_v37, %v105_v14  ;;  %v1889_v37 = vperm.slane %v103_v6, 1 }
  0xa5   :  { %2298 = vst [vmem:[#allocation22_spill] sm:$0xff] %v1881_v38 }
  0xa6   :  { %2302 = vst [vmem:[#allocation26_spill] sm:$0xff] %v1889_v37 }
  0xa9   :  { %v313_v44 = vpop.f32.mrf.mxu3 }
  0xaa   :  { %v175_v49 = vpop.f32.mrf.mxu0  ;;  %v356_v55 = vadd.f32 %v313_v44, %v164_v41  ;;  %v205_v41 = vadd.f32 %v204_v5, %v1889_v37 }
  0xab   :  { %v1883_v60 = vadd.f32 %v175_v49, %v105_v14 }
  0xac   :  { %v1230_v3 = vmul.f32 -1.442695, %v356_v55 }
  0xad   :  { %2299 = vst [vmem:[#allocation23_spill] sm:$0xff] %v1883_v60 }
  0xae   :  { %1258 = vpow2.f32 %v1230_v3 }
  0xb2   :  { %v178_v39 = vpop.f32.mrf.mxu0 }
  0xb3   :  { %v1885_v17 = vadd.f32 %v178_v39, %v105_v14  ;;  %v1892_v39 = vpop.f32.mrf.mxu2 }
  0xb4   :  { %v1259_v22 = vpop.eup %1258  ;;  %2303 = vst [vmem:[#allocation27_spill] sm:$0xff] %v1892_v39 }
  0xb5   :  { %2300 = vst [vmem:[#allocation24_spill] sm:$0xff] %v1885_v17  ;;  %v360_v25 = vadd.f32 1.0, %v1259_v22 }
  0xb7   :  { %1260 = vrcp.f32 %v360_v25  ;;  %vm366_vm3 = vweird.f32 %v360_v25 }
  0xba   :  { %v181_v26 = vpop.f32.mrf.mxu0 }
  0xbb   :  { %v1887_v51 = vadd.f32 %v181_v26, %v105_v14  ;;  %v372_v14 = vand.u32 2147483648, %v360_v25  ;;  %v370_v26 = vand.u32 2147483647, %v360_v25 }
  0xbd   :  { %2301 = vst [vmem:[#allocation25_spill] sm:$0xff] %v1887_v51  ;;  %v1261_v29 = vpop.eup %1260  ;;  %v1897_v51 = vld [vmem:[%s2263_s4] ss:$0 sm:$0xff]  ;;  %vm371_vm5 = vcmp.eq.f32.partialorder %v370_v26, 8.507059e+37 }
  0xbe   :  { %v362_v38 = vmul.f32 %v1261_v29, %v360_v25  ;;  %vm367_vm2 = vweird.f32 %v1261_v29 }
  0xbf   :  { %vm368_vm4 = vmor %vm366_vm3, %vm367_vm2 }
  0xc0   :  { %v363_v44 = vsub.f32 1.0, %v362_v38 }
  0xc2   :  { %v364_v60 = vmul.f32 %v1261_v29, %v363_v44  ;;  %v353_v5 = vpop.f32.mrf.mxu0 }
  0xc3   :  { %v399_v44 = vadd.f32 %v1897_v51, %v353_v5 }
  0xc4   :  { %v365_v22 = vadd.f32 %v1261_v29, %v364_v60 }
  0xc6   :  { %v369_v38 = vsel %vm368_vm4, %v1261_v29, %v365_v22 }
  0xc9   :  { %v333_v49 = vpop.f32.mrf.mxu3 }
  0xca   :  { %v376_v55 = vadd.f32 %v333_v49, %v205_v41  ;;  %v373_v49 = vor.u32 1.1754944e-38, %v372_v14 }
  0xcc   :  { %v1231_v3 = vmul.f32 -1.442695, %v376_v55  ;;  %v1900_v55 = vperm.slane %v103_v6, 2  ;;  %v374_v60 = vsel %vm371_vm5, %v373_v49, %v369_v38 }
  0xcd   :  { %v400_v25 = vmul.f32 %v399_v44, %v374_v60  ;;  %v207_v60 = vpop.f32.mrf.mxu1 }
  0xce   :  { %1262 = vpow2.f32 %v1231_v3  ;;  %v245_v3 = vpop.f32.mrf.mxu2 }
  0xcf   :  { %v246_v39 = vadd.f32 %v245_v3, %v1900_v55 }
  0xd1   :  { %v401_v2 = vadd.f32 %v400_v25, %v246_v39  ;;  %v2310_v39 = vld [vmem:[#allocation18_spill] sm:$0xff] }
  0xd4   :  { %v1263_v17 = vpop.eup %1262 }
  0xd5   :  { %v380_v41 = vadd.f32 1.0, %v1263_v17  ;;  %v1958_v25 = vpop.f32.mrf.mxu1 }
  0xd6   :  { %2312 = vst [vmem:[#allocation29_spill] sm:$0xff] %v1958_v25  ;;  %v2322_v25 = vld [vmem:[#allocation19_spill] sm:$0xff] }
  0xd7   :  { %1264 = vrcp.f32 %v380_v41  ;;  %v392_v48 = vand.u32 2147483648, %v380_v41  ;;  %v390_v17 = vand.u32 2147483647, %v380_v41  ;;  %vm386_vm7 = vweird.f32 %v380_v41 }
  0xd8   :  { %1266 = vtanh.f32 %v401_v2  ;;  %v2307_v2 = vld [vmem:[#allocation17_spill] sm:$0xff] }
  0xd9   :  { %v393_v6 = vor.u32 1.1754944e-38, %v392_v48  ;;  %vm391_vm9 = vcmp.eq.f32.partialorder %v390_v17, 8.507059e+37  ;;  %v2305_v48 = vld [vmem:[#allocation13_spill] sm:$0xff] }
  0xdd   :  { %v1265_v34 = vpop.eup %1264 }
  0xde   :  { %v382_v37 = vmul.f32 %v1265_v34, %v380_v41  ;;  %vm387_vm6 = vweird.f32 %v1265_v34  ;;  %v1267_v5 = vpop.eup %1266  ;;  %v248_v41 = vpop.f32.mrf.mxu2 }
  0xdf   :  { %vm388_vm8 = vmor %vm386_vm7, %vm387_vm6 }
  0xe0   :  { %v383_v35 = vsub.f32 1.0, %v382_v37  ;;  %v2309_v37 = vld [vmem:[#allocation11_spill] sm:$0xff] }
  0xe2   :  { %v384_v63 = vmul.f32 %v1265_v34, %v383_v35  ;;  %v2304_v35 = vld [vmem:[#allocation16_spill] sm:$0xff] }
  0xe4   :  { %v385_v29 = vadd.f32 %v1265_v34, %v384_v63  ;;  %v2306_v63 = vld [vmem:[#allocation10_spill] sm:$0xff] }
  0xe6   :  { %v389_v22 = vsel %vm388_vm8, %v1265_v34, %v385_v29  ;;  %v2308_v34 = vld [vmem:[#allocation14_spill] sm:$0xff]  ;;  %v1956_v3 = vpop.f32.mrf.mxu2  ;;  %v1962_v29 = vpop.f32.mrf.mxu1 }
  0xe7   :  { %v394_v14 = vsel %vm391_vm9, %v393_v6, %v389_v22  ;;  %2311 = vst [vmem:[#allocation28_spill] sm:$0xff] %v1956_v3 }
  0xe8   :  { %v403_v26 = vsub.f32 1.0, %v394_v14  ;;  %v405_v49 = vmul.f32 0.0, %v394_v14  ;;  %2314 = vst [vmem:[#allocation31_spill] sm:$0xff] %v1962_v29 }
  0xea   :  { %v404_v38 = vmul.f32 %v1267_v5, %v403_v26 }
  0xec   :  { %v1903_v44 = vadd.f32 %v405_v49, %v404_v38 }
  0xee   :  { %426 = vmatmul.f32.vlgmr.msrb.gmra.mxu1 %v1903_v44  ;;  %446 = vmatmul.f32.vlgmr.msrb.gmra.mxu2 %v1903_v44  ;;  %v1960_v17 = vpop.f32.mrf.mxu2  ;;  %v1966_v22 = vpop.f32.mrf.mxu1 }
  0xef   :  { %466 = vmatmul.f32.vlgmr.msra.gmra.mxu3 %v1903_v44  ;;  %672 = vmatpush.msrb.mxu1 %v1509_v9  ;;  %2313 = vst [vmem:[#allocation30_spill] sm:$0xff] %v1960_v17 }
  0xf0   :  { %743 = vmatpush.msrb.mxu2 %v1477_v0  ;;  %763 = vmatpush.msra.mxu3 %v1629_v42  ;;  %2316 = vst [vmem:[#allocation33_spill] sm:$0xff] %v1966_v22 }
  0xf1   :  { %673 = vmatpush.msrb.mxu1 %v1515_v11 }
  0xf2   :  { %744 = vmatpush.msrb.mxu2 %v1479_v1  ;;  %764 = vmatpush.msra.mxu3 %v1638_v45 }
  0xf3   :  { %674 = vmatpush.msrb.mxu1 %v1517_v12 }
  0xf4   :  { %745 = vmatpush.msrb.mxu2 %v1489_v4  ;;  %765 = vmatpush.msra.mxu3 %v1646_v47 }
  0xf5   :  { %675 = vmatpush.msrb.mxu1 %v1531_v16 }
  0xf6   :  { %746 = vmatpush.msrb.mxu2 %v1501_v7  ;;  %766 = vmatpush.msra.mxu3 %v1659_v50  ;;  %v1964_v6 = vpop.f32.mrf.mxu2  ;;  %v1970_v26 = vpop.f32.mrf.mxu1 }
  0xf7   :  { %676 = vmatpush.msrb.mxu1 %v1543_v19  ;;  %2315 = vst [vmem:[#allocation32_spill] sm:$0xff] %v1964_v6 }
  0xf8   :  { %747 = vmatpush.msrb.mxu2 %v1504_v8  ;;  %767 = vmatpush.msra.mxu3 %v1667_v52  ;;  %2318 = vst [vmem:[#allocation35_spill] sm:$0xff] %v1970_v26 }
  0xf9   :  { %677 = vmatpush.msrb.mxu1 %v1551_v21 }
  0xfa   :  { %748 = vmatpush.msrb.mxu2 %v1511_v10  ;;  %768 = vmatpush.msra.mxu3 %v1674_v53 }
  0xfb   :  { %678 = vmatpush.msrb.mxu1 %v1560_v24 }
  0xfc   :  { %749 = vmatpush.msrb.mxu2 %v1519_v13  ;;  %769 = vmatpush.msra.mxu3 %v1682_v54 }
  0xfd   :  { %679 = vmatpush.msrb.mxu1 %v1576_v28 }
  0xfe   :  { %750 = vmatpush.msrb.mxu2 %v1528_v15  ;;  %770 = vmatpush.msra.mxu3 %v1693_v56  ;;  %v1968_v14 = vpop.f32.mrf.mxu2  ;;  %v1974_v38 = vpop.f32.mrf.mxu1 }
  0xff   :  { %680 = vmatpush.msrb.mxu1 %v1587_v31  ;;  %2317 = vst [vmem:[#allocation34_spill] sm:$0xff] %v1968_v14 }
 0x100   :  { %751 = vmatpush.msrb.mxu2 %v1539_v18  ;;  %771 = vmatpush.msra.mxu3 %v1699_v57  ;;  %2320 = vst [vmem:[#allocation37_spill] sm:$0xff] %v1974_v38 }
 0x101   :  { %681 = vmatpush.msrb.mxu1 %v1593_v33 }
 0x102   :  { %752 = vmatpush.msrb.mxu2 %v1549_v20  ;;  %772 = vmatpush.msra.mxu3 %v1706_v58 }
 0x103   :  { %682 = vmatpush.msrb.mxu1 %v1604_v36 }
 0x104   :  { %753 = vmatpush.msrb.mxu2 %v1558_v23  ;;  %773 = vmatpush.msra.mxu3 %v1714_v59 }
 0x105   :  { %683 = vmatpush.msrb.mxu1 %v1621_v40 }
 0x106   :  { %754 = vmatpush.msrb.mxu2 %v1574_v27  ;;  %774 = vmatpush.msra.mxu3 %v1725_v61  ;;  %v1972_v5 = vpop.f32.mrf.mxu2 }
 0x107   :  { %684 = vmatpush.msrb.mxu1 %v1633_v43  ;;  %2319 = vst [vmem:[#allocation36_spill] sm:$0xff] %v1972_v5 }
 0x108   :  { %755 = vmatpush.msrb.mxu2 %v1583_v30  ;;  %775 = vmatpush.msra.mxu3 %v1731_v62 }
 0x109   :  { %685 = vmatpush.msrb.mxu1 %v1640_v46 }
 0x10a   :  { %756 = vmatpush.msrb.mxu2 %v1591_v32  ;;  %776 = vmatpush.msra.mxu3 %v2304_v35 }
 0x10b   :  { %686 = vmatpush.msrb.mxu1 %v2305_v48 }
 0x10c   :  { %757 = vmatpush.msrb.mxu2 %v2306_v63  ;;  %777 = vmatpush.msra.mxu3 %v2307_v2 }
 0x10d   :  { %687 = vmatpush.msrb.mxu1 %v2308_v34 }
 0x10e   :  { %758 = vmatpush.msrb.mxu2 %v2309_v37  ;;  %778 = vmatpush.msra.mxu3 %v2310_v39  ;;  %v1976_v49 = vpop.f32.mrf.mxu2  ;;  %v2323_v37 = vld [vmem:[#allocation26_spill] sm:$0xff] }
 0x10f   :  { %2321 = vst [vmem:[#allocation38_spill] sm:$0xff] %v1976_v49  ;;  %v208_v29 = vadd.f32 %v207_v60, %v2323_v37 }
 0x16b   :  { %v427_v3 = vpop.f32.mrf.mxu1 }
 0x16c   :  { %v470_v39 = vadd.f32 %v427_v3, %v2322_v25 }
 0x16e   :  { %v1232_v17 = vmul.f32 -1.442695, %v470_v39 }
 0x170   :  { %1268 = vpow2.f32 %v1232_v17 }
 0x171   :  { %v447_v6 = vpop.f32.mrf.mxu2 }
 0x172   :  { %v490_v34 = vadd.f32 %v447_v6, %v208_v29  ;;  %v467_v60 = vpop.f32.mrf.mxu3 }
 0x173   :  { %v510_v6 = vadd.f32 %v1897_v51, %v467_v60 }
 0x174   :  { %v1233_v22 = vmul.f32 -1.442695, %v490_v34 }
 0x176   :  { %v1269_v2 = vpop.eup %1268  ;;  %1270 = vpow2.f32 %v1233_v22  ;;  %v249_v22 = vadd.f32 %v248_v41, %v1900_v55 }
 0x177   :  { %v474_v14 = vadd.f32 1.0, %v1269_v2 }
 0x179   :  { %1272 = vrcp.f32 %v474_v14  ;;  %v486_v48 = vand.u32 2147483648, %v474_v14  ;;  %v484_v39 = vand.u32 2147483647, %v474_v14  ;;  %vm480_vm11 = vweird.f32 %v474_v14 }
 0x17b   :  { %v487_v34 = vor.u32 1.1754944e-38, %v486_v48  ;;  %vm485_vm13 = vcmp.eq.f32.partialorder %v484_v39, 8.507059e+37 }
 0x17c   :  { %v1271_v26 = vpop.eup %1270 }
 0x17d   :  { %v494_v5 = vadd.f32 1.0, %v1271_v26 }
 0x17f   :  { %v1273_v63 = vpop.eup %1272  ;;  %1274 = vrcp.f32 %v494_v5  ;;  %v504_v32 = vand.u32 2147483647, %v494_v5  ;;  %vm500_vm15 = vweird.f32 %v494_v5 }
 0x180   :  { %v476_v38 = vmul.f32 %v1273_v63, %v474_v14  ;;  %vm481_vm10 = vweird.f32 %v1273_v63 }
 0x181   :  { %vm482_vm12 = vmor %vm480_vm11, %vm481_vm10  ;;  %vm505_vm1 = vcmp.eq.f32.partialorder %v504_v32, 8.507059e+37 }
 0x182   :  { %v477_v49 = vsub.f32 1.0, %v476_v38 }
 0x184   :  { %v478_v35 = vmul.f32 %v1273_v63, %v477_v49  ;;  %v506_v49 = vand.u32 2147483648, %v494_v5 }
 0x185   :  { %v1275_v3 = vpop.eup %1274 }
 0x186   :  { %v496_v25 = vmul.f32 %v1275_v3, %v494_v5  ;;  %v479_v17 = vadd.f32 %v1273_v63, %v478_v35  ;;  %vm501_vm14 = vweird.f32 %v1275_v3  ;;  %v507_v48 = vor.u32 1.1754944e-38, %v506_v49  ;;  %v2337_v49 = vld [vmem:[#allocation28_spill] sm:$0xff] }
 0x187   :  { %vm502_vm0 = vmor %vm500_vm15, %vm501_vm14 }
 0x188   :  { %v497_v29 = vsub.f32 1.0, %v496_v25  ;;  %v483_v2 = vsel %vm482_vm12, %v1273_v63, %v479_v17 }
 0x189   :  { %v488_v26 = vsel %vm485_vm13, %v487_v34, %v483_v2 }
 0x18a   :  { %v498_v38 = vmul.f32 %v1275_v3, %v497_v29  ;;  %v511_v37 = vmul.f32 %v510_v6, %v488_v26 }
 0x18c   :  { %v512_v46 = vadd.f32 %v511_v37, %v249_v22  ;;  %v499_v62 = vadd.f32 %v1275_v3, %v498_v38 }
 0x18e   :  { %1276 = vtanh.f32 %v512_v46  ;;  %v503_v35 = vsel %vm502_vm0, %v1275_v3, %v499_v62 }
 0x18f   :  { %v508_v63 = vsel %vm505_vm1, %v507_v48, %v503_v35  ;;  %v252_v35 = vadd.f32 %v2337_v49, %v1900_v55 }
 0x190   :  { %v514_v14 = vsub.f32 1.0, %v508_v63  ;;  %v516_v41 = vmul.f32 %v508_v63, %v1903_v44 }
 0x194   :  { %v1277_v39 = vpop.eup %1276 }
 0x195   :  { %v515_v60 = vmul.f32 %v1277_v39, %v514_v14 }
 0x197   :  { %v1983_v25 = vadd.f32 %v516_v41, %v515_v60 }
 0x199   :  { %537 = vmatmul.f32.vlgmr.msra.gmra.mxu0 %v1983_v25  ;;  %557 = vmatmul.f32.vlgmr.msra.gmra.mxu1 %v1983_v25 }
 0x19a   :  { %577 = vmatmul.f32.vlgmr.msra.gmra.mxu2 %v1983_v25  ;;  %783 = vmatpush.msra.mxu0 %v1509_v9  ;;  %v2329_v9 = vld [vmem:[#allocation10_spill] sm:$0xff] }
 0x19b   :  { %854 = vmatpush.msra.mxu1 %v1477_v0  ;;  %874 = vmatpush.msra.mxu2 %v1629_v42  ;;  %v2324_v0 = vld [vmem:[#allocation15_spill] sm:$0xff] }
 0x19c   :  { %784 = vmatpush.msra.mxu0 %v1515_v11  ;;  %v2331_v11 = vld [vmem:[#allocation14_spill] sm:$0xff] }
 0x19d   :  { %855 = vmatpush.msra.mxu1 %v1479_v1  ;;  %875 = vmatpush.msra.mxu2 %v1638_v45  ;;  %v2325_v1 = vld [vmem:[#allocation12_spill] sm:$0xff] }
 0x19e   :  { %785 = vmatpush.msra.mxu0 %v1517_v12  ;;  %v2332_v12 = vld [vmem:[#allocation11_spill] sm:$0xff] }
 0x19f   :  { %856 = vmatpush.msra.mxu1 %v1489_v4  ;;  %876 = vmatpush.msra.mxu2 %v1646_v47  ;;  %v2326_v4 = vld [vmem:[#allocation9_spill] sm:$0xff] }
 0x1a0   :  { %786 = vmatpush.msra.mxu0 %v1531_v16  ;;  %v2335_v16 = vld [vmem:[#allocation29_spill] sm:$0xff] }
 0x1a1   :  { %857 = vmatpush.msra.mxu1 %v1501_v7  ;;  %877 = vmatpush.msra.mxu2 %v1659_v50  ;;  %v2327_v7 = vld [vmem:[#allocation16_spill] sm:$0xff] }
 0x1a2   :  { %787 = vmatpush.msra.mxu0 %v1543_v19 }
 0x1a3   :  { %858 = vmatpush.msra.mxu1 %v1504_v8  ;;  %878 = vmatpush.msra.mxu2 %v1667_v52  ;;  %v2328_v8 = vld [vmem:[#allocation13_spill] sm:$0xff] }
 0x1a4   :  { %788 = vmatpush.msra.mxu0 %v1551_v21  ;;  %v2336_v21 = vld [vmem:[#allocation21_spill] sm:$0xff] }
 0x1a5   :  { %859 = vmatpush.msra.mxu1 %v1511_v10  ;;  %879 = vmatpush.msra.mxu2 %v1674_v53  ;;  %v2330_v10 = vld [vmem:[#allocation17_spill] sm:$0xff] }
 0x1a6   :  { %789 = vmatpush.msra.mxu0 %v1560_v24 }
 0x1a7   :  { %860 = vmatpush.msra.mxu1 %v1519_v13  ;;  %880 = vmatpush.msra.mxu2 %v1682_v54  ;;  %v2333_v13 = vld [vmem:[#allocation18_spill] sm:$0xff] }
 0x1a8   :  { %790 = vmatpush.msra.mxu0 %v1576_v28 }
 0x1a9   :  { %861 = vmatpush.msra.mxu1 %v1528_v15  ;;  %881 = vmatpush.msra.mxu2 %v1693_v56  ;;  %v2334_v15 = vld [vmem:[#allocation26_spill] sm:$0xff] }
 0x1aa   :  { %791 = vmatpush.msra.mxu0 %v1587_v31 }
 0x1ab   :  { %862 = vmatpush.msra.mxu1 %v1539_v18  ;;  %882 = vmatpush.msra.mxu2 %v1699_v57  ;;  %v211_v18 = vadd.f32 %v2335_v16, %v2334_v15  ;;  %v2048_v16 = vld [vmem:[#allocation3 + $0x178] sm:$0xff] }
 0x1ac   :  { %792 = vmatpush.msra.mxu0 %v1593_v33 }
 0x1ad   :  { %863 = vmatpush.msra.mxu1 %v1549_v20  ;;  %883 = vmatpush.msra.mxu2 %v1706_v58 }
 0x1ae   :  { %793 = vmatpush.msra.mxu0 %v1604_v36 }
 0x1af   :  { %864 = vmatpush.msra.mxu1 %v1558_v23  ;;  %884 = vmatpush.msra.mxu2 %v1714_v59 }
 0x1b0   :  { %794 = vmatpush.msra.mxu0 %v1621_v40 }
 0x1b1   :  { %865 = vmatpush.msra.mxu1 %v1574_v27  ;;  %885 = vmatpush.msra.mxu2 %v1725_v61 }
 0x1b2   :  { %795 = vmatpush.msra.mxu0 %v1633_v43 }
 0x1b3   :  { %866 = vmatpush.msra.mxu1 %v1583_v30  ;;  %886 = vmatpush.msra.mxu2 %v2324_v0 }
 0x1b4   :  { %796 = vmatpush.msra.mxu0 %v2325_v1 }
 0x1b5   :  { %867 = vmatpush.msra.mxu1 %v2326_v4  ;;  %887 = vmatpush.msra.mxu2 %v2327_v7 }
 0x1b6   :  { %797 = vmatpush.msra.mxu0 %v2328_v8 }
 0x1b7   :  { %868 = vmatpush.msra.mxu1 %v2329_v9  ;;  %888 = vmatpush.msra.mxu2 %v2330_v10 }
 0x1b8   :  { %798 = vmatpush.msra.mxu0 %v2331_v11 }
 0x1b9   :  { %869 = vmatpush.msra.mxu1 %v2332_v12  ;;  %889 = vmatpush.msra.mxu2 %v2333_v13 }
 0x216   :  { %v538_v19 = vpop.f32.mrf.mxu0  ;;  %v558_v20 = vpop.f32.mrf.mxu1 }
 0x217   :  { %v581_v23 = vadd.f32 %v538_v19, %v2336_v21  ;;  %v601_v24 = vadd.f32 %v558_v20, %v211_v18  ;;  %v2051_v18 = vld [vmem:[#allocation3 + $0x168] sm:$0xff]  ;;  %v2055_v19 = vld [vmem:[#allocation3 + $0x160] sm:$0xff]  ;;  %v2065_v21 = vld [vmem:[#allocation3 + $0x138] sm:$0xff] }
 0x218   :  { %v2062_v20 = vld [vmem:[#allocation3 + $0x148] sm:$0xff] }
 0x219   :  { %v1234_v27 = vmul.f32 -1.442695, %v581_v23  ;;  %v1235_v28 = vmul.f32 -1.442695, %v601_v24  ;;  %v2072_v23 = vld [vmem:[#allocation3 + $0x120] sm:$0xff]  ;;  %v2079_v24 = vld [vmem:[#allocation3 + $0x108] sm:$0xff] }
 0x21b   :  { %1278 = vpow2.f32 %v1234_v27  ;;  %v2086_v27 = vld [vmem:[#allocation3 + $0xf0] sm:$0xff] }
 0x21c   :  { %1280 = vpow2.f32 %v1235_v28  ;;  %v2093_v28 = vld [vmem:[#allocation3 + $0xd8] sm:$0xff] }
 0x21d   :  { %v578_v34 = vpop.f32.mrf.mxu2 }
 0x21e   :  { %v621_v22 = vadd.f32 %v1897_v51, %v578_v34  ;;  %v2339_v34 = vld [vmem:[#allocation22_spill] sm:$0xff] }
 0x221   :  { %v1279_v30 = vpop.eup %1278 }
 0x222   :  { %v1281_v31 = vpop.eup %1280  ;;  %v585_v32 = vadd.f32 1.0, %v1279_v30  ;;  %v2100_v30 = vld [vmem:[#allocation3 + $0xc0] sm:$0xff] }
 0x223   :  { %v605_v33 = vadd.f32 1.0, %v1281_v31  ;;  %v2107_v31 = vld [vmem:[#allocation3 + $0xa8] sm:$0xff] }
 0x224   :  { %1282 = vrcp.f32 %v585_v32  ;;  %v597_v37 = vand.u32 2147483648, %v585_v32  ;;  %v595_v3 = vand.u32 2147483647, %v585_v32  ;;  %vm591_vm3 = vweird.f32 %v585_v32 }
 0x225   :  { %1284 = vrcp.f32 %v605_v33  ;;  %v617_v63 = vand.u32 2147483648, %v605_v33  ;;  %vm611_vm7 = vweird.f32 %v605_v33  ;;  %v615_v14 = vand.u32 2147483647, %v605_v33 }
 0x226   :  { %v598_v2 = vor.u32 1.1754944e-38, %v597_v37  ;;  %vm596_vm5 = vcmp.eq.f32.partialorder %v595_v3, 8.507059e+37 }
 0x227   :  { %v618_v41 = vor.u32 1.1754944e-38, %v617_v63  ;;  %vm616_vm9 = vcmp.eq.f32.partialorder %v615_v14, 8.507059e+37 }
 0x22a   :  { %v1283_v36 = vpop.eup %1282 }
 0x22b   :  { %v1285_v40 = vpop.eup %1284  ;;  %v587_v43 = vmul.f32 %v1283_v36, %v585_v32  ;;  %vm592_vm2 = vweird.f32 %v1283_v36  ;;  %v2114_v32 = vld [vmem:[#allocation3 + $0x90] sm:$0xff] }
 0x22c   :  { %v607_v46 = vmul.f32 %v1285_v40, %v605_v33  ;;  %vm593_vm4 = vmor %vm591_vm3, %vm592_vm2  ;;  %vm612_vm6 = vweird.f32 %v1285_v40  ;;  %v2121_v33 = vld [vmem:[#allocation3 + $0x78] sm:$0xff] }
 0x22d   :  { %v588_v62 = vsub.f32 1.0, %v587_v43  ;;  %vm613_vm8 = vmor %vm611_vm7, %vm612_vm6  ;;  %v2142_v43 = vld [vmem:[#allocation3 + $0x30] sm:$0xff] }
 0x22e   :  { %v608_v44 = vsub.f32 1.0, %v607_v46  ;;  %v2149_v46 = vld [vmem:[#allocation3 + $0x18] sm:$0xff] }
 0x22f   :  { %v589_v5 = vmul.f32 %v1283_v36, %v588_v62  ;;  %v2156_v62 = vld [vmem:[#allocation3] sm:$0xff] }
 0x230   :  { %v609_v17 = vmul.f32 %v1285_v40, %v608_v44 }
 0x231   :  { %v590_v29 = vadd.f32 %v1283_v36, %v589_v5 }
 0x232   :  { %v610_v38 = vadd.f32 %v1285_v40, %v609_v17 }
 0x233   :  { %v594_v6 = vsel %vm593_vm4, %v1283_v36, %v590_v29  ;;  %v2128_v36 = vld [vmem:[#allocation3 + $0x60] sm:$0xff] }
 0x234   :  { %v599_v26 = vsel %vm596_vm5, %v598_v2, %v594_v6  ;;  %v614_v60 = vsel %vm613_vm8, %v1285_v40, %v610_v38  ;;  %v2135_v40 = vld [vmem:[#allocation3 + $0x48] sm:$0xff] }
 0x235   :  { %v622_v48 = vmul.f32 %v621_v22, %v599_v26  ;;  %v619_v1 = vsel %vm616_vm9, %v618_v41, %v614_v60 }
 0x236   :  { %v625_v4 = vsub.f32 1.0, %v619_v1  ;;  %v627_v11 = vmul.f32 %v619_v1, %v1983_v25  ;;  %v2058_v25 = vld [vmem:[#allocation3 + $0x150] sm:$0xff] }
 0x237   :  { %v623_v39 = vadd.f32 %v622_v48, %v252_v35 }
 0x239   :  { %1286 = vtanh.f32 %v623_v39 }
 0x23f   :  { %v1287_v8 = vpop.eup %1286 }
 0x240   :  { %v626_v9 = vmul.f32 %v1287_v8, %v625_v4 }
 0x242   :  { %v2043_v12 = vadd.f32 %v627_v11, %v626_v9 }
 0x244   :  { %648 = vmatmul.f32.vlgmr.msrb.gmra.mxu3 %v2043_v12  ;;  %668 = vmatmul.f32.vlgmr.msrb.gmra.mxu0 %v2043_v12 }
 0x245   :  { %688 = vmatmul.f32.vlgmr.msrb.gmra.mxu1 %v2043_v12  ;;  %894 = vmatpush.msrb.mxu3 %v2048_v16 }
 0x246   :  { %965 = vmatpush.msrb.mxu0 %v2051_v18  ;;  %985 = vmatpush.msrb.mxu1 %v1629_v42  ;;  %v2069_v42 = vld [vmem:[#allocation3 + $0x130] sm:$0xff] }
 0x247   :  { %895 = vmatpush.msrb.mxu3 %v2055_v19 }
 0x248   :  { %966 = vmatpush.msrb.mxu0 %v2058_v25  ;;  %986 = vmatpush.msrb.mxu1 %v1638_v45  ;;  %v2076_v45 = vld [vmem:[#allocation3 + $0x118] sm:$0xff] }
 0x249   :  { %896 = vmatpush.msrb.mxu3 %v2062_v20 }
 0x24a   :  { %967 = vmatpush.msrb.mxu0 %v2065_v21  ;;  %987 = vmatpush.msrb.mxu1 %v1646_v47  ;;  %v2083_v47 = vld [vmem:[#allocation3 + $0x100] sm:$0xff] }
 0x24b   :  { %897 = vmatpush.msrb.mxu3 %v2069_v42 }
 0x24c   :  { %968 = vmatpush.msrb.mxu0 %v2072_v23  ;;  %988 = vmatpush.msrb.mxu1 %v1659_v50  ;;  %v2090_v50 = vld [vmem:[#allocation3 + $0xe8] sm:$0xff] }
 0x24d   :  { %898 = vmatpush.msrb.mxu3 %v2076_v45 }
 0x24e   :  { %969 = vmatpush.msrb.mxu0 %v2079_v24  ;;  %989 = vmatpush.msrb.mxu1 %v1667_v52  ;;  %v2097_v52 = vld [vmem:[#allocation3 + $0xd0] sm:$0xff] }
 0x24f   :  { %899 = vmatpush.msrb.mxu3 %v2083_v47 }
 0x250   :  { %970 = vmatpush.msrb.mxu0 %v2086_v27  ;;  %990 = vmatpush.msrb.mxu1 %v1674_v53  ;;  %v2104_v53 = vld [vmem:[#allocation3 + $0xb8] sm:$0xff] }
 0x251   :  { %900 = vmatpush.msrb.mxu3 %v2090_v50 }
 0x252   :  { %971 = vmatpush.msrb.mxu0 %v2093_v28  ;;  %991 = vmatpush.msrb.mxu1 %v1682_v54  ;;  %v2111_v54 = vld [vmem:[#allocation3 + $0xa0] sm:$0xff] }
 0x253   :  { %901 = vmatpush.msrb.mxu3 %v2097_v52 }
 0x254   :  { %972 = vmatpush.msrb.mxu0 %v2100_v30  ;;  %992 = vmatpush.msrb.mxu1 %v1693_v56  ;;  %v2118_v56 = vld [vmem:[#allocation3 + $0x88] sm:$0xff] }
 0x255   :  { %902 = vmatpush.msrb.mxu3 %v2104_v53 }
 0x256   :  { %973 = vmatpush.msrb.mxu0 %v2107_v31  ;;  %993 = vmatpush.msrb.mxu1 %v1699_v57  ;;  %v2125_v57 = vld [vmem:[#allocation3 + $0x70] sm:$0xff] }
 0x257   :  { %903 = vmatpush.msrb.mxu3 %v2111_v54 }
 0x258   :  { %974 = vmatpush.msrb.mxu0 %v2114_v32  ;;  %994 = vmatpush.msrb.mxu1 %v1706_v58  ;;  %v2132_v58 = vld [vmem:[#allocation3 + $0x58] sm:$0xff] }
 0x259   :  { %904 = vmatpush.msrb.mxu3 %v2118_v56 }
 0x25a   :  { %975 = vmatpush.msrb.mxu0 %v2121_v33  ;;  %995 = vmatpush.msrb.mxu1 %v1714_v59  ;;  %v2139_v59 = vld [vmem:[#allocation3 + $0x40] sm:$0xff] }
 0x25b   :  { %905 = vmatpush.msrb.mxu3 %v2125_v57 }
 0x25c   :  { %976 = vmatpush.msrb.mxu0 %v2128_v36  ;;  %996 = vmatpush.msrb.mxu1 %v1725_v61  ;;  %v2146_v61 = vld [vmem:[#allocation3 + $0x28] sm:$0xff] }
 0x25d   :  { %906 = vmatpush.msrb.mxu3 %v2132_v58 }
 0x25e   :  { %977 = vmatpush.msrb.mxu0 %v2135_v40  ;;  %997 = vmatpush.msrb.mxu1 %v2324_v0  ;;  %v2153_v0 = vld [vmem:[#allocation3 + $0x10] sm:$0xff] }
 0x25f   :  { %907 = vmatpush.msrb.mxu3 %v2139_v59 }
 0x260   :  { %978 = vmatpush.msrb.mxu0 %v2142_v43  ;;  %998 = vmatpush.msrb.mxu1 %v2327_v7  ;;  %v2338_v7 = vld [vmem:[#allocation31_spill] sm:$0xff] }
 0x261   :  { %908 = vmatpush.msrb.mxu3 %v2146_v61  ;;  %v214_v44 = vadd.f32 %v2338_v7, %v2334_v15 }
 0x262   :  { %979 = vmatpush.msrb.mxu0 %v2149_v46  ;;  %999 = vmatpush.msrb.mxu1 %v2330_v10 }
 0x263   :  { %909 = vmatpush.msrb.mxu3 %v2153_v0 }
 0x264   :  { %980 = vmatpush.msrb.mxu0 %v2156_v62  ;;  %1000 = vmatpush.msrb.mxu1 %v2333_v13 }
 0x2c1   :  { %v669_v37 = vpop.f32.mrf.mxu0 }
 0x2c2   :  { %v712_v5 = vadd.f32 %v669_v37, %v214_v44  ;;  %v689_v1 = vpop.f32.mrf.mxu1  ;;  %v2340_v37 = vld [vmem:[#allocation30_spill] sm:$0xff] }
 0x2c3   :  { %v732_v9 = vadd.f32 %v1897_v51, %v689_v1 }
 0x2c4   :  { %v1237_v3 = vmul.f32 -1.442695, %v712_v5  ;;  %v255_v5 = vadd.f32 %v2340_v37, %v1900_v55 }
 0x2c6   :  { %1288 = vpow2.f32 %v1237_v3 }
 0x2c7   :  { %v649_v17 = vpop.f32.mrf.mxu3 }
 0x2c8   :  { %v692_v10 = vadd.f32 %v649_v17, %v2339_v34 }
 0x2ca   :  { %v1236_v29 = vmul.f32 -1.442695, %v692_v10 }
 0x2cc   :  { %v1289_v2 = vpop.eup %1288  ;;  %1290 = vpow2.f32 %v1236_v29 }
 0x2cd   :  { %v716_v6 = vadd.f32 1.0, %v1289_v2 }
 0x2cf   :  { %1292 = vrcp.f32 %v716_v6  ;;  %v728_v3 = vand.u32 2147483648, %v716_v6  ;;  %vm722_vm15 = vweird.f32 %v716_v6  ;;  %v726_v34 = vand.u32 2147483647, %v716_v6 }
 0x2d1   :  { %v729_v2 = vor.u32 1.1754944e-38, %v728_v3  ;;  %vm727_vm1 = vcmp.eq.f32.partialorder %v726_v34, 8.507059e+37 }
 0x2d2   :  { %v1291_v22 = vpop.eup %1290 }
 0x2d3   :  { %v696_v26 = vadd.f32 1.0, %v1291_v22 }
 0x2d5   :  { %1294 = vrcp.f32 %v696_v26  ;;  %v1293_v38 = vpop.eup %1292  ;;  %v708_v14 = vand.u32 2147483648, %v696_v26  ;;  %v706_v60 = vand.u32 2147483647, %v696_v26  ;;  %vm702_vm11 = vweird.f32 %v696_v26 }
 0x2d6   :  { %v718_v13 = vmul.f32 %v1293_v38, %v716_v6  ;;  %vm723_vm14 = vweird.f32 %v1293_v38  ;;  %v1370_v6 = vld [vmem:[#allocation3 + $0x170] sm:$0xff] }
 0x2d7   :  { %v709_v8 = vor.u32 1.1754944e-38, %v708_v14  ;;  %vm707_vm13 = vcmp.eq.f32.partialorder %v706_v60, 8.507059e+37  ;;  %vm724_vm0 = vmor %vm722_vm15, %vm723_vm14 }
 0x2d8   :  { %v719_v48 = vsub.f32 1.0, %v718_v13 }
 0x2da   :  { %v720_v41 = vmul.f32 %v1293_v38, %v719_v48 }
 0x2db   :  { %v1295_v49 = vpop.eup %1294 }
 0x2dc   :  { %v698_v35 = vmul.f32 %v1295_v49, %v696_v26  ;;  %vm703_vm10 = vweird.f32 %v1295_v49  ;;  %v721_v44 = vadd.f32 %v1293_v38, %v720_v41 }
 0x2dd   :  { %vm704_vm12 = vmor %vm702_vm11, %vm703_vm10 }
 0x2de   :  { %v699_v63 = vsub.f32 1.0, %v698_v35  ;;  %v725_v29 = vsel %vm724_vm0, %v1293_v38, %v721_v44  ;;  %v1371_v38 = vld [vmem:[#allocation3 + $0x158] sm:$0xff] }
 0x2df   :  { %v730_v22 = vsel %vm727_vm1, %v729_v2, %v725_v29 }
 0x2e0   :  { %v700_v39 = vmul.f32 %v1295_v49, %v699_v63  ;;  %v736_v26 = vsub.f32 1.0, %v730_v22  ;;  %v738_v35 = vmul.f32 %v730_v22, %v2043_v12  ;;  %v1372_v12 = vld [vmem:[#allocation3 + $0x140] sm:$0xff]  ;;  %v1373_v63 = vld [vmem:[#allocation3 + $0x128] sm:$0xff] }
 0x2e2   :  { %v701_v4 = vadd.f32 %v1295_v49, %v700_v39 }
 0x2e4   :  { %v705_v11 = vsel %vm704_vm12, %v1295_v49, %v701_v4 }
 0x2e5   :  { %v710_v7 = vsel %vm707_vm13, %v709_v8, %v705_v11 }
 0x2e6   :  { %v733_v17 = vmul.f32 %v732_v9, %v710_v7 }
 0x2e8   :  { %v734_v10 = vadd.f32 %v733_v17, %v255_v5 }
 0x2ea   :  { %1296 = vtanh.f32 %v734_v10 }
 0x2f0   :  { %v1297_v13 = vpop.eup %1296 }
 0x2f1   :  { %v737_v49 = vmul.f32 %v1297_v13, %v736_v26 }
 0x2f3   :  { %v2167_v48 = vadd.f32 %v738_v35, %v737_v49 }
 0x2f5   :  { %759 = vmatmul.f32.vlgmr.msrb.gmra.mxu2 %v2167_v48  ;;  %779 = vmatmul.f32.vlgmr.msra.gmra.mxu3 %v2167_v48 }
 0x2f6   :  { %799 = vmatmul.f32.vlgmr.msra.gmra.mxu0 %v2167_v48  ;;  %1005 = vmatpush.msrb.mxu2 %v2048_v16 }
 0x2f7   :  { %1076 = vmatpush.msra.mxu3 %v2051_v18  ;;  %1096 = vmatpush.msra.mxu0 %v1370_v6  ;;  %v1374_v18 = vld [vmem:[#allocation3 + $0x110] sm:$0xff] }
 0x2f8   :  { %1006 = vmatpush.msrb.mxu2 %v2055_v19 }
 0x2f9   :  { %1077 = vmatpush.msra.mxu3 %v2058_v25  ;;  %1097 = vmatpush.msra.mxu0 %v1371_v38  ;;  %v1375_v25 = vld [vmem:[#allocation3 + $0xf8] sm:$0xff] }
 0x2fa   :  { %1007 = vmatpush.msrb.mxu2 %v2062_v20 }
 0x2fb   :  { %1078 = vmatpush.msra.mxu3 %v2065_v21  ;;  %1098 = vmatpush.msra.mxu0 %v1372_v12  ;;  %v1376_v21 = vld [vmem:[#allocation3 + $0xe0] sm:$0xff] }
 0x2fc   :  { %1008 = vmatpush.msrb.mxu2 %v2069_v42  ;;  %v2343_v12 = vld [vmem:[#allocation32_spill] sm:$0xff] }
 0x2fd   :  { %1079 = vmatpush.msra.mxu3 %v2072_v23  ;;  %1099 = vmatpush.msra.mxu0 %v1373_v63  ;;  %v1377_v23 = vld [vmem:[#allocation3 + $0xc8] sm:$0xff]  ;;  %v258_v63 = vadd.f32 %v2343_v12, %v1900_v55 }
 0x2fe   :  { %1009 = vmatpush.msrb.mxu2 %v2076_v45 }
 0x2ff   :  { %1080 = vmatpush.msra.mxu3 %v2079_v24  ;;  %1100 = vmatpush.msra.mxu0 %v1374_v18  ;;  %v1378_v24 = vld [vmem:[#allocation3 + $0xb0] sm:$0xff] }
 0x300   :  { %1010 = vmatpush.msrb.mxu2 %v2083_v47 }
 0x301   :  { %1081 = vmatpush.msra.mxu3 %v2086_v27  ;;  %1101 = vmatpush.msra.mxu0 %v1375_v25  ;;  %v1379_v27 = vld [vmem:[#allocation3 + $0x98] sm:$0xff] }
 0x302   :  { %1011 = vmatpush.msrb.mxu2 %v2090_v50 }
 0x303   :  { %1082 = vmatpush.msra.mxu3 %v2093_v28  ;;  %1102 = vmatpush.msra.mxu0 %v1376_v21  ;;  %v1380_v28 = vld [vmem:[#allocation3 + $0x80] sm:$0xff] }
 0x304   :  { %1012 = vmatpush.msrb.mxu2 %v2097_v52 }
 0x305   :  { %1083 = vmatpush.msra.mxu3 %v2100_v30  ;;  %1103 = vmatpush.msra.mxu0 %v1377_v23  ;;  %v1381_v30 = vld [vmem:[#allocation3 + $0x68] sm:$0xff] }
 0x306   :  { %1013 = vmatpush.msrb.mxu2 %v2104_v53 }
 0x307   :  { %1084 = vmatpush.msra.mxu3 %v2107_v31  ;;  %1104 = vmatpush.msra.mxu0 %v1378_v24  ;;  %v1382_v31 = vld [vmem:[#allocation3 + $0x50] sm:$0xff] }
 0x308   :  { %1014 = vmatpush.msrb.mxu2 %v2111_v54 }
 0x309   :  { %1085 = vmatpush.msra.mxu3 %v2114_v32  ;;  %1105 = vmatpush.msra.mxu0 %v1379_v27  ;;  %v1383_v32 = vld [vmem:[#allocation3 + $0x38] sm:$0xff] }
 0x30a   :  { %1015 = vmatpush.msrb.mxu2 %v2118_v56 }
 0x30b   :  { %1086 = vmatpush.msra.mxu3 %v2121_v33  ;;  %1106 = vmatpush.msra.mxu0 %v1380_v28  ;;  %v1384_v33 = vld [vmem:[#allocation3 + $0x20] sm:$0xff] }
 0x30c   :  { %1016 = vmatpush.msrb.mxu2 %v2125_v57 }
 0x30d   :  { %1087 = vmatpush.msra.mxu3 %v2128_v36  ;;  %1107 = vmatpush.msra.mxu0 %v1381_v30  ;;  %v1385_v36 = vld [vmem:[#allocation3 + $0x8] sm:$0xff] }
 0x30e   :  { %1017 = vmatpush.msrb.mxu2 %v2132_v58 }
 0x30f   :  { %1088 = vmatpush.msra.mxu3 %v2135_v40  ;;  %1108 = vmatpush.msra.mxu0 %v1382_v31  ;;  %v2341_v40 = vld [vmem:[#allocation33_spill] sm:$0xff] }
 0x310   :  { %1018 = vmatpush.msrb.mxu2 %v2139_v59  ;;  %v217_v14 = vadd.f32 %v2341_v40, %v2334_v15 }
 0x311   :  { %1089 = vmatpush.msra.mxu3 %v2142_v43  ;;  %1109 = vmatpush.msra.mxu0 %v1383_v32  ;;  %v2342_v43 = vld [vmem:[#allocation23_spill] sm:$0xff] }
 0x312   :  { %1019 = vmatpush.msrb.mxu2 %v2146_v61 }
 0x313   :  { %1090 = vmatpush.msra.mxu3 %v2149_v46  ;;  %1110 = vmatpush.msra.mxu0 %v1384_v33 }
 0x314   :  { %1020 = vmatpush.msrb.mxu2 %v2153_v0 }
 0x315   :  { %1091 = vmatpush.msra.mxu3 %v2156_v62  ;;  %1111 = vmatpush.msra.mxu0 %v1385_v36 }
 0x373   :  { %v800_v2 = vpop.f32.mrf.mxu0 }
 0x374   :  { %v843_v49 = vadd.f32 %v1897_v51, %v800_v2 }
 0x378   :  { %v760_v39 = vpop.f32.mrf.mxu2  ;;  %v780_v60 = vpop.f32.mrf.mxu3 }
 0x379   :  { %v803_v41 = vadd.f32 %v760_v39, %v2342_v43  ;;  %v823_v1 = vadd.f32 %v780_v60, %v217_v14 }
 0x37b   :  { %v1238_v4 = vmul.f32 -1.442695, %v803_v41  ;;  %v1239_v8 = vmul.f32 -1.442695, %v823_v1 }
 0x37d   :  { %1298 = vpow2.f32 %v1238_v4 }
 0x37e   :  { %1300 = vpow2.f32 %v1239_v8  ;;  %v2238_v8 = vld [vmem:[%s2263_s4] ss:$0 sm:$0xff]  ;;  %s1443_s4 = smov [#allocation6]  }
 0x37f   :  { %s1191_s10 = sshll.u32 %s1443_s4, 4  ;;  %s1192_s10 = int_to_ptr.vmem [resolvable:$true] %s1191_s10 }
 0x383   :  { %v1299_v46 = vpop.eup %1298 }
 0x384   :  { %v1301_v9 = vpop.eup %1300  ;;  %v807_v11 = vadd.f32 1.0, %v1299_v46 }
 0x385   :  { %v827_v7 = vadd.f32 1.0, %v1301_v9  ;;  %v2346_v9 = vld [vmem:[#allocation34_spill] sm:$0xff] }
 0x386   :  { %1302 = vrcp.f32 %v807_v11  ;;  %v819_v17 = vand.u32 2147483648, %v807_v11  ;;  %v817_v29 = vand.u32 2147483647, %v807_v11  ;;  %vm813_vm3 = vweird.f32 %v807_v11 }
 0x387   :  { %1304 = vrcp.f32 %v827_v7  ;;  %v839_v18 = vand.u32 2147483648, %v827_v7  ;;  %vm833_vm7 = vweird.f32 %v827_v7  ;;  %v837_v21 = vand.u32 2147483647, %v827_v7 }
 0x388   :  { %v820_v13 = vor.u32 1.1754944e-38, %v819_v17  ;;  %vm818_vm5 = vcmp.eq.f32.partialorder %v817_v29, 8.507059e+37 }
 0x389   :  { %v840_v27 = vor.u32 1.1754944e-38, %v839_v18  ;;  %vm838_vm9 = vcmp.eq.f32.partialorder %v837_v21, 8.507059e+37 }
 0x38c   :  { %v1303_v62 = vpop.eup %1302 }
 0x38d   :  { %v1305_v44 = vpop.eup %1304  ;;  %v809_v37 = vmul.f32 %v1303_v62, %v807_v11  ;;  %vm814_vm2 = vweird.f32 %v1303_v62  ;;  %v261_v11 = vadd.f32 %v2346_v9, %v1900_v55  ;;  %v2350_v9 = vld [vmem:[#allocation27_spill] sm:$0xff] }
 0x38e   :  { %v829_v5 = vmul.f32 %v1305_v44, %v827_v7  ;;  %vm815_vm4 = vmor %vm813_vm3, %vm814_vm2  ;;  %vm834_vm6 = vweird.f32 %v1305_v44 }
 0x38f   :  { %v810_v3 = vsub.f32 1.0, %v809_v37  ;;  %vm835_vm8 = vmor %vm833_vm7, %vm834_vm6 }
 0x390   :  { %v830_v34 = vsub.f32 1.0, %v829_v5 }
 0x391   :  { %v811_v10 = vmul.f32 %v1303_v62, %v810_v3 }
 0x392   :  { %v831_v22 = vmul.f32 %v1305_v44, %v830_v34 }
 0x393   :  { %v812_v26 = vadd.f32 %v1303_v62, %v811_v10 }
 0x394   :  { %v832_v38 = vadd.f32 %v1305_v44, %v831_v22 }
 0x395   :  { %v816_v35 = vsel %vm815_vm4, %v1303_v62, %v812_v26 }
 0x396   :  { %v821_v6 = vsel %vm818_vm5, %v820_v13, %v816_v35  ;;  %v836_v24 = vsel %vm835_vm8, %v1305_v44, %v832_v38  ;;  %v2347_v35 = vld [vmem:[#allocation37_spill] sm:$0xff] }
 0x397   :  { %v844_v25 = vmul.f32 %v843_v49, %v821_v6  ;;  %v841_v28 = vsel %vm838_vm9, %v840_v27, %v836_v24  ;;  %v223_v6 = vadd.f32 %v2347_v35, %v2334_v15 }
 0x398   :  { %v847_v51 = vsub.f32 1.0, %v841_v28  ;;  %v849_v32 = vmul.f32 %v841_v28, %v2167_v48 }
 0x399   :  { %v845_v23 = vadd.f32 %v844_v25, %v258_v63  ;;  %v2348_v63 = vld [vmem:[#allocation25_spill] sm:$0xff] }
 0x39b   :  { %1306 = vtanh.f32 %v845_v23 }
 0x3a1   :  { %v1307_v30 = vpop.eup %1306 }
 0x3a2   :  { %v848_v31 = vmul.f32 %v1307_v30, %v847_v51 }
 0x3a4   :  { %v2211_v33 = vadd.f32 %v849_v32, %v848_v31 }
 0x3a6   :  { %870 = vmatmul.f32.vlgmr.msra.gmra.mxu1 %v2211_v33  ;;  %890 = vmatmul.f32.vlgmr.msra.gmra.mxu2 %v2211_v33 }
 0x3a7   :  { %910 = vmatmul.f32.vlgmr.msrb.gmra.mxu3 %v2211_v33  ;;  %1116 = vmatpush.msra.mxu1 %v2048_v16 }
 0x3a9   :  { %1117 = vmatpush.msra.mxu1 %v2055_v19  ;;  %v2344_v19 = vld [vmem:[#allocation24_spill] sm:$0xff] }
 0x3ab   :  { %1118 = vmatpush.msra.mxu1 %v2062_v20 }
 0x3ad   :  { %1119 = vmatpush.msra.mxu1 %v2069_v42 }
 0x3af   :  { %1120 = vmatpush.msra.mxu1 %v2076_v45  ;;  %v2345_v45 = vld [vmem:[#allocation35_spill] sm:$0xff] }
 0x3b1   :  { %1121 = vmatpush.msra.mxu1 %v2083_v47  ;;  %v220_v47 = vadd.f32 %v2345_v45, %v2334_v15 }
 0x3b3   :  { %1122 = vmatpush.msra.mxu1 %v2090_v50 }
 0x3b5   :  { %1123 = vmatpush.msra.mxu1 %v2097_v52 }
 0x3b7   :  { %1124 = vmatpush.msra.mxu1 %v2104_v53 }
 0x3b9   :  { %1125 = vmatpush.msra.mxu1 %v2111_v54 }
 0x3bb   :  { %1126 = vmatpush.msra.mxu1 %v2118_v56 }
 0x3bd   :  { %1127 = vmatpush.msra.mxu1 %v2125_v57 }
 0x3bf   :  { %1128 = vmatpush.msra.mxu1 %v2132_v58 }
 0x3c1   :  { %1129 = vmatpush.msra.mxu1 %v2139_v59 }
 0x3c3   :  { %1130 = vmatpush.msra.mxu1 %v2146_v61 }
 0x3c5   :  { %1131 = vmatpush.msra.mxu1 %v2153_v0 }
 0x423   :  { %v871_v16 = vpop.f32.mrf.mxu1 }
 0x424   :  { %v914_v20 = vadd.f32 %v871_v16, %v2344_v19 }
 0x426   :  { %v1240_v42 = vmul.f32 -1.442695, %v914_v20 }
 0x428   :  { %1308 = vpow2.f32 %v1240_v42 }
 0x429   :  { %v891_v50 = vpop.f32.mrf.mxu2 }
 0x42a   :  { %v934_v52 = vadd.f32 %v891_v50, %v220_v47  ;;  %v911_v39 = vpop.f32.mrf.mxu3 }
 0x42b   :  { %v954_v46 = vadd.f32 %v2238_v8, %v911_v39 }
 0x42c   :  { %v1241_v53 = vmul.f32 -1.442695, %v934_v52 }
 0x42e   :  { %v1309_v54 = vpop.eup %1308  ;;  %1310 = vpow2.f32 %v1241_v53 }
 0x42f   :  { %v918_v56 = vadd.f32 1.0, %v1309_v54 }
 0x431   :  { %1312 = vrcp.f32 %v918_v56  ;;  %v930_v48 = vand.u32 2147483648, %v918_v56  ;;  %v928_v40 = vand.u32 2147483647, %v918_v56  ;;  %vm924_vm11 = vweird.f32 %v918_v56 }
 0x433   :  { %v931_v41 = vor.u32 1.1754944e-38, %v930_v48  ;;  %vm929_vm13 = vcmp.eq.f32.partialorder %v928_v40, 8.507059e+37 }
 0x434   :  { %v1311_v57 = vpop.eup %1310 }
 0x435   :  { %v938_v58 = vadd.f32 1.0, %v1311_v57 }
 0x437   :  { %v1313_v59 = vpop.eup %1312  ;;  %1314 = vrcp.f32 %v938_v58  ;;  %v950_v37 = vand.u32 2147483648, %v938_v58  ;;  %v948_v5 = vand.u32 2147483647, %v938_v58  ;;  %vm944_vm15 = vweird.f32 %v938_v58 }
 0x438   :  { %v920_v61 = vmul.f32 %v1313_v59, %v918_v56  ;;  %vm925_vm10 = vweird.f32 %v1313_v59 }
 0x439   :  { %vm926_vm12 = vmor %vm924_vm11, %vm925_vm10  ;;  %v951_v10 = vor.u32 1.1754944e-38, %v950_v37  ;;  %vm949_vm1 = vcmp.eq.f32.partialorder %v948_v5, 8.507059e+37  ;;  %v2351_v5 = vld [vmem:[#allocation20_spill] sm:$0xff] }
 0x43a   :  { %v921_v0 = vsub.f32 1.0, %v920_v61 }
 0x43c   :  { %v922_v36 = vmul.f32 %v1313_v59, %v921_v0 }
 0x43d   :  { %v1315_v14 = vpop.eup %1314 }
 0x43e   :  { %v940_v60 = vmul.f32 %v1315_v14, %v938_v58  ;;  %v923_v43 = vadd.f32 %v1313_v59, %v922_v36  ;;  %vm945_vm14 = vweird.f32 %v1315_v14 }
 0x43f   :  { %vm946_vm0 = vmor %vm944_vm15, %vm945_vm14 }
 0x440   :  { %v941_v1 = vsub.f32 1.0, %v940_v60  ;;  %v927_v4 = vsel %vm926_vm12, %v1313_v59, %v923_v43  ;;  %v2349_v59 = vld [vmem:[#allocation36_spill] sm:$0xff] }
 0x441   :  { %v932_v7 = vsel %vm929_vm13, %v931_v41, %v927_v4  ;;  %v264_v61 = vadd.f32 %v2349_v59, %v1900_v55 }
 0x442   :  { %v942_v62 = vmul.f32 %v1315_v14, %v941_v1  ;;  %v955_v44 = vmul.f32 %v954_v46, %v932_v7 }
 0x444   :  { %v956_v3 = vadd.f32 %v955_v44, %v261_v11  ;;  %v943_v17 = vadd.f32 %v1315_v14, %v942_v62  ;;  %v226_v11 = vadd.f32 %v2350_v9, %v2334_v15 }
 0x446   :  { %1316 = vtanh.f32 %v956_v3  ;;  %v947_v34 = vsel %vm946_vm0, %v1315_v14, %v943_v17 }
 0x447   :  { %v952_v29 = vsel %vm949_vm1, %v951_v10, %v947_v34 }
 0x448   :  { %v958_v2 = vsub.f32 1.0, %v952_v29  ;;  %v960_v13 = vmul.f32 %v952_v29, %v2211_v33 }
 0x44c   :  { %v1317_v22 = vpop.eup %1316 }
 0x44d   :  { %v959_v26 = vmul.f32 %v1317_v22, %v958_v2 }
 0x44f   :  { %v961_v49 = vadd.f32 %v960_v13, %v959_v26 }
 0x451   :  { %981 = vmatmul.f32.vlgmr.msrb.gmra.mxu0 %v961_v49  ;;  %1001 = vmatmul.f32.vlgmr.msrb.gmra.mxu1 %v961_v49 }
 0x452   :  { %1021 = vmatmul.f32.vlgmr.msrb.gmra.mxu2 %v961_v49 }
 0x4ce   :  { %v982_v38 = vpop.f32.mrf.mxu0  ;;  %v1002_v12 = vpop.f32.mrf.mxu1 }
 0x4cf   :  { %v1025_v18 = vadd.f32 %v982_v38, %v2348_v63  ;;  %v1045_v25 = vadd.f32 %v1002_v12, %v223_v6 }
 0x4d1   :  { %v1242_v21 = vmul.f32 -1.442695, %v1025_v18  ;;  %v1243_v23 = vmul.f32 -1.442695, %v1045_v25 }
 0x4d3   :  { %1318 = vpow2.f32 %v1242_v21 }
 0x4d4   :  { %1320 = vpow2.f32 %v1243_v23 }
 0x4d5   :  { %v1022_v50 = vpop.f32.mrf.mxu2 }
 0x4d6   :  { %v1065_v56 = vadd.f32 %v2238_v8, %v1022_v50 }
 0x4d9   :  { %v1319_v24 = vpop.eup %1318 }
 0x4da   :  { %v1321_v27 = vpop.eup %1320  ;;  %v1029_v28 = vadd.f32 1.0, %v1319_v24 }
 0x4db   :  { %v1049_v51 = vadd.f32 1.0, %v1321_v27 }
 0x4dc   :  { %1322 = vrcp.f32 %v1029_v28  ;;  %v1041_v20 = vand.u32 2147483648, %v1029_v28  ;;  %v1039_v45 = vand.u32 2147483647, %v1029_v28  ;;  %vm1035_vm3 = vweird.f32 %v1029_v28 }
 0x4dd   :  { %1324 = vrcp.f32 %v1049_v51  ;;  %v1061_v48 = vand.u32 2147483648, %v1049_v51  ;;  %vm1055_vm7 = vweird.f32 %v1049_v51  ;;  %v1059_v36 = vand.u32 2147483647, %v1049_v51 }
 0x4de   :  { %v1042_v53 = vor.u32 1.1754944e-38, %v1041_v20  ;;  %vm1040_vm5 = vcmp.eq.f32.partialorder %v1039_v45, 8.507059e+37 }
 0x4df   :  { %v1062_v39 = vor.u32 1.1754944e-38, %v1061_v48  ;;  %vm1060_vm9 = vcmp.eq.f32.partialorder %v1059_v36, 8.507059e+37 }
 0x4e2   :  { %v1323_v30 = vpop.eup %1322 }
 0x4e3   :  { %v1325_v31 = vpop.eup %1324  ;;  %v1031_v32 = vmul.f32 %v1323_v30, %v1029_v28  ;;  %vm1036_vm2 = vweird.f32 %v1323_v30 }
 0x4e4   :  { %v1051_v33 = vmul.f32 %v1325_v31, %v1049_v51  ;;  %vm1037_vm4 = vmor %vm1035_vm3, %vm1036_vm2  ;;  %vm1056_vm6 = vweird.f32 %v1325_v31  ;;  %v2352_v51 = vld [vmem:[#allocation38_spill] sm:$0xff]  ;;  %vm1184_vm2 = vcmask 254976  }
 0x4e5   :  { %v1032_v16 = vsub.f32 1.0, %v1031_v32  ;;  %vm1057_vm8 = vmor %vm1055_vm7, %vm1056_vm6 }
 0x4e6   :  { %v1052_v19 = vsub.f32 1.0, %v1051_v33 }
 0x4e7   :  { %v1033_v42 = vmul.f32 %v1323_v30, %v1032_v16 }
 0x4e8   :  { %v1053_v47 = vmul.f32 %v1325_v31, %v1052_v19 }
 0x4e9   :  { %v1034_v52 = vadd.f32 %v1323_v30, %v1033_v42 }
 0x4ea   :  { %v1054_v58 = vadd.f32 %v1325_v31, %v1053_v47 }
 0x4eb   :  { %v1038_v54 = vsel %vm1037_vm4, %v1323_v30, %v1034_v52  ;;  %v267_v30 = vadd.f32 %v2352_v51, %v1900_v55 }
 0x4ec   :  { %v1043_v57 = vsel %vm1040_vm5, %v1042_v53, %v1038_v54  ;;  %v1058_v14 = vsel %vm1057_vm8, %v1325_v31, %v1054_v58 }
 0x4ed   :  { %v1066_v0 = vmul.f32 %v1065_v56, %v1043_v57  ;;  %v1063_v60 = vsel %vm1060_vm9, %v1062_v39, %v1058_v14 }
 0x4ee   :  { %v1069_v43 = vsub.f32 1.0, %v1063_v60  ;;  %v1071_v4 = vmul.f32 %v1063_v60, %v961_v49 }
 0x4ef   :  { %v1067_v40 = vadd.f32 %v1066_v0, %v264_v61 }
 0x4f1   :  { %1326 = vtanh.f32 %v1067_v40 }
 0x4f7   :  { %v1327_v41 = vpop.eup %1326 }
 0x4f8   :  { %v1070_v1 = vmul.f32 %v1327_v41, %v1069_v43 }
 0x4fa   :  { %v1072_v46 = vadd.f32 %v1071_v4, %v1070_v1 }
 0x4fc   :  { %1092 = vmatmul.f32.vlgmr.msra.gmra.mxu3 %v1072_v46  ;;  %1112 = vmatmul.f32.vlgmr.msra.gmra.mxu0 %v1072_v46 }
 0x4fd   :  { %1132 = vmatmul.f32.vlgmr.msra.gmra.mxu1 %v1072_v46 }
 0x579   :  { %v1113_v7 = vpop.f32.mrf.mxu0 }
 0x57a   :  { %v1156_v62 = vadd.f32 %v1113_v7, %v226_v11  ;;  %v1133_v18 = vpop.f32.mrf.mxu1 }
 0x57b   :  { %v1176_v23 = vadd.f32 %v2238_v8, %v1133_v18 }
 0x57c   :  { %v1245_v44 = vmul.f32 -1.442695, %v1156_v62 }
 0x57e   :  { %1328 = vpow2.f32 %v1245_v44 }
 0x57f   :  { %v1093_v37 = vpop.f32.mrf.mxu3 }
 0x580   :  { %v1136_v3 = vadd.f32 %v1093_v37, %v2351_v5 }
 0x582   :  { %v1244_v17 = vmul.f32 -1.442695, %v1136_v3 }
 0x584   :  { %v1329_v34 = vpop.eup %1328  ;;  %1330 = vpow2.f32 %v1244_v17 }
 0x585   :  { %v1160_v10 = vadd.f32 1.0, %v1329_v34 }
 0x587   :  { %1332 = vrcp.f32 %v1160_v10  ;;  %v1172_v31 = vand.u32 2147483648, %v1160_v10  ;;  %vm1166_vm15 = vweird.f32 %v1160_v10  ;;  %v1170_v33 = vand.u32 2147483647, %v1160_v10 }
 0x589   :  { %v1173_v20 = vor.u32 1.1754944e-38, %v1172_v31  ;;  %vm1171_vm1 = vcmp.eq.f32.partialorder %v1170_v33, 8.507059e+37 }
 0x58a   :  { %v1331_v29 = vpop.eup %1330 }
 0x58b   :  { %v1140_v2 = vadd.f32 1.0, %v1331_v29 }
 0x58d   :  { %1334 = vrcp.f32 %v1140_v2  ;;  %v1333_v22 = vpop.eup %1332  ;;  %v1152_v6 = vand.u32 2147483648, %v1140_v2  ;;  %v1150_v12 = vand.u32 2147483647, %v1140_v2  ;;  %vm1146_vm11 = vweird.f32 %v1140_v2 }
 0x58e   :  { %v1162_v26 = vmul.f32 %v1333_v22, %v1160_v10  ;;  %vm1167_vm14 = vweird.f32 %v1333_v22 }
 0x58f   :  { %v1153_v21 = vor.u32 1.1754944e-38, %v1152_v6  ;;  %vm1151_vm13 = vcmp.eq.f32.partialorder %v1150_v12, 8.507059e+37  ;;  %vm1168_vm0 = vmor %vm1166_vm15, %vm1167_vm14 }
 0x590   :  { %v1163_v15 = vsub.f32 1.0, %v1162_v26 }
 0x592   :  { %v1164_v63 = vmul.f32 %v1333_v22, %v1163_v15 }
 0x593   :  { %v1335_v13 = vpop.eup %1334 }
 0x594   :  { %v1142_v49 = vmul.f32 %v1335_v13, %v1140_v2  ;;  %vm1147_vm10 = vweird.f32 %v1335_v13  ;;  %v1165_v28 = vadd.f32 %v1333_v22, %v1164_v63 }
 0x595   :  { %vm1148_vm12 = vmor %vm1146_vm11, %vm1147_vm10 }
 0x596   :  { %v1143_v35 = vsub.f32 1.0, %v1142_v49  ;;  %v1169_v19 = vsel %vm1168_vm0, %v1333_v22, %v1165_v28 }
 0x597   :  { %v1174_v42 = vsel %vm1171_vm1, %v1173_v20, %v1169_v19 }
 0x598   :  { %v1144_v38 = vmul.f32 %v1335_v13, %v1143_v35  ;;  %v1180_v8 = vsub.f32 1.0, %v1174_v42  ;;  %v1182_v47 = vmul.f32 %v1174_v42, %v1072_v46 }
 0x59a   :  { %v1145_v25 = vadd.f32 %v1335_v13, %v1144_v38 }
 0x59c   :  { %v1149_v24 = vsel %vm1148_vm12, %v1335_v13, %v1145_v25 }
 0x59d   :  { %v1154_v27 = vsel %vm1151_vm13, %v1153_v21, %v1149_v24 }
 0x59e   :  { %v1177_v32 = vmul.f32 %v1176_v23, %v1154_v27 }
 0x5a0   :  { %v1178_v16 = vadd.f32 %v1177_v32, %v267_v30 }
 0x5a2   :  { %1336 = vtanh.f32 %v1178_v16 }
 0x5a8   :  { %v1337_v45 = vpop.eup %1336 }
 0x5a9   :  { %v1181_v55 = vmul.f32 %v1337_v45, %v1180_v8 }
 0x5ab   :  { %v1183_v50 = vadd.f32 %v1182_v47, %v1181_v55 }
 0x5ad   :  { %1185 = vst.msk [vmem:[#allocation6] sm:$0x3] %vm1184_vm2, %v1183_v50 }
 0x5ae   :  { %1196 = dma.vmem_to_hbm [thread:$0]  %s1192_s10, 32, %s1194_s13, [#allocation5]  }
 0x5af   :  { %1437 = dma.done.wait [#allocation5], 32  }
 0x5b0   :  { %1438 = vsyncadd [#allocation5], 4294967264 }
 0x5b1   :  { %1201 = vsyncpa [#allocation4], 1 }
 0x5b2   :  { %1202 = vsyncpa [#allocation5], 1 }

</bundles_post_ra>
